<compile_context>
chip_gen: v7x
topology: tpu7x:2x2x1
jax: 0.10.0
libtpu: 0.0.40
codegen_flags: <defaults>
</compile_context>

<pallas_src>
import functools
import math

import jax
import jax.numpy as jnp
from jax.experimental import pallas as pl
from jax.experimental.pallas import tpu as pltpu


def _context_kernel(x_ref, wkv_ref, wout_ref, mask_ref, m_out_ref,
                    m_sc, l_sc, ctx_sc, *, hidden, n_valid, n_tile,
                    mxu_dtype, approx):
    """Pass 1: flash-style accumulation of the k-softmax context over n-tiles.

    Per grid step (batch squeezed):
      x_ref    : (dim, tn)          padded input tile (f32)
      wkv_ref  : (2*hidden, dim)    stacked [W_k; W_v] (mxu_dtype)
      wout_ref : (dim, hidden)      output projection, q-scale folded (mxu_dtype)
      mask_ref : (hidden, hidden)   per-head block-diagonal mask (f32, resident)
      m_out_ref: (dim, hidden)      fused M = W_out @ mask(ctx_norm)^T (mxu_dtype)
      m_sc     : (hidden, 1)        running row-max of K
      l_sc     : (hidden, 1)        running row-sum of exp(K - m)
      ctx_sc   : (hidden, hidden)   running exp(K - m) @ V^T
    """
    j = pl.program_id(1)

    @pl.when(j == 0)
    def _():
        m_sc[...] = jnp.full_like(m_sc, -jnp.inf)
        l_sc[...] = jnp.zeros_like(l_sc)
        ctx_sc[...] = jnp.zeros_like(ctx_sc)

    x = x_ref[...].astype(mxu_dtype)                                    # (dim, tn)
    # Single fused K/V projection: stream x through the MXU once.
    kv = jnp.dot(wkv_ref[...], x, preferred_element_type=jnp.float32)   # (2*hidden, tn)
    k = kv[:hidden]                                                     # (hidden, tn)
    v = kv[hidden:]                                                     # (hidden, tn)

    # Mask padded tail columns so they contribute nothing to max/sum/context.
    if n_valid % n_tile != 0:
        col = jax.lax.broadcasted_iota(jnp.int32, (1, n_tile), 1) + j * n_tile
        k = jnp.where(col < n_valid, k, jnp.float32(-1e30))

    m_prev = m_sc[...]
    m_new = jnp.maximum(m_prev, jnp.max(k, axis=1, keepdims=True))      # (hidden, 1)
    alpha = jnp.exp(m_prev - m_new)                                     # (hidden, 1)
    p = jnp.exp(k - m_new)                                              # (hidden, tn); 0 in pad cols

    l_sc[...] = alpha * l_sc[...] + jnp.sum(p, axis=1, keepdims=True)
    pv = jax.lax.dot_general(p.astype(mxu_dtype), v.astype(mxu_dtype),
                             (((1,), (1,)), ((), ())),
                             preferred_element_type=jnp.float32)        # (hidden, hidden)
    ctx_sc[...] = alpha * ctx_sc[...] + pv
    m_sc[...] = m_new

    @pl.when(j == pl.num_programs(1) - 1)
    def _():
        # Normalize rows by the k-softmax denominator (l >= 1, safe).
        ctx_n = ctx_sc[...] * pl.reciprocal(l_sc[...], approx=approx)   # (hidden, hidden)
        # Keep only the per-head (block-diagonal) part of the context.
        ctx_m = ctx_n * mask_ref[...]
        # M[c, r] = sum_e W_out[c, e] * ctx_m[r, e]   (contract over e)
        m_out_ref[...] = jax.lax.dot_general(
            wout_ref[...], ctx_m.astype(mxu_dtype),
            (((1,), (1,)), ((), ())),
            preferred_element_type=jnp.float32).astype(m_out_ref.dtype)


def _output_kernel(x_ref, m_ref, wq_ref, gb_ref, o_ref, *,
                   heads, dim_head, mxu_dtype, approx):
    """Pass 2: per n-tile per-head q-softmax + fused output projection + RMSNorm.

      x_ref  : (dim, tn)       padded input tile (f32)
      m_ref  : (dim, hidden)   fused W_out * context (scale folded in), mxu_dtype
      wq_ref : (hidden, dim)   q projection (mxu_dtype)
      gb_ref : (dim, 2)        column 0 = conv bias, column 1 = g * sqrt(dim)
      o_ref  : (dim, tn)       output tile
    """
    hidden = heads * dim_head
    tn = x_ref.shape[-1]

    x = x_ref[...].astype(mxu_dtype)                                    # (dim, tn)
    q = jnp.dot(wq_ref[...], x, preferred_element_type=jnp.float32)     # (hidden, tn)

    # Per-head softmax over the feature axis via segmented sublane reductions
    # (exact per-head max; keeps the denominator work off the MXU).
    q3 = q.reshape(heads, dim_head, tn)
    qe3 = jnp.exp(q3 - jnp.max(q3, axis=1, keepdims=True))              # (h, d, tn)
    seg3 = jnp.sum(qe3, axis=1, keepdims=True)                          # (h, 1, tn), >= 1
    qs = (qe3 * pl.reciprocal(seg3, approx=approx)).reshape(hidden, tn)

    # Output projection fused with the context: y = M @ q_s + b
    y = jnp.dot(m_ref[...], qs.astype(mxu_dtype),
                preferred_element_type=jnp.float32)                     # (dim, tn)
    y = y + gb_ref[:, 0:1]

    # RMSNorm over channels: y / max(||y||, 1e-12) * g * sqrt(dim)
    ss = jnp.sum(y * y, axis=0, keepdims=True)                          # (1, tn)
    inv_norm = jax.lax.rsqrt(jnp.maximum(ss, 1e-24))
    o_ref[...] = (y * inv_norm * gb_ref[:, 1:2]).astype(o_ref.dtype)


def _choose_n_tile(n):
    # >= 512 amortizes per-grid-step overhead; small n gets one padded tile.
    if n >= 512:
        return 512
    return max(128, -(-n // 128) * 128)


def linear_attention_pallas(x, w_qkv, w_out, b_out, g, *, heads, dim_head,
                            mxu_dtype=jnp.bfloat16, n_tile=None):
    """x: (b, dim, n) float32 -> (b, dim, n).

    mxu_dtype: dtype of MXU matmul operands (accumulation is always f32).
               bf16 (default) is the fast path on v5e/v6e/v7x; jnp.float32
               gives a reference-accurate path.
    """
    b, dim, n = x.shape
    hidden = heads * dim_head
    assert w_qkv.shape == (3 * hidden, dim)
    assert w_out.shape == (dim, hidden)

    if n_tile is None:
        n_tile = _choose_n_tile(n)
    assert n_tile % 128 == 0, n_tile              # lane-dense tiles
    assert n_tile <= 1024, n_tile                 # stay well under v7x's 64 MiB VMEM

    # Pad the sequence to a whole number of tiles; pass 1 masks the tail columns,
    # pass 2's padded output columns are sliced off below.
    n_pad = -(-n // n_tile) * n_tile
    n_tiles = n_pad // n_tile
    x_p = jnp.pad(x, ((0, 0), (0, 0), (0, n_pad - n))) if n_pad != n else x

    scale = dim_head ** -0.5
    approx = mxu_dtype == jnp.bfloat16  # approximate EUP reciprocal on fast path only

    # Host-side constant folding / packing (all O(dim*hidden), independent of n).
    w_q = w_qkv[:hidden].astype(mxu_dtype)
    w_kv = w_qkv[hidden:].astype(mxu_dtype)                              # [W_k; W_v] (2*hidden, dim)
    w_out_s = (w_out.astype(jnp.float32) * scale).astype(mxu_dtype)      # fold q scale
    gb = jnp.stack([b_out.astype(jnp.float32),
                    g.astype(jnp.float32) * math.sqrt(float(dim))], axis=1)  # (dim, 2)
    head_id = jnp.arange(hidden, dtype=jnp.int32) // dim_head
    blk_mask = (head_id[:, None] == head_id[None, :]).astype(jnp.float32)    # (hidden, hidden)

    # ---- Pass 1: per-batch fused context matrix M (dim, hidden) ----
    ctx_kernel = functools.partial(
        _context_kernel, hidden=hidden, n_valid=n, n_tile=n_tile,
        mxu_dtype=mxu_dtype, approx=approx)

    m_mat = pl.pallas_call(
        ctx_kernel,
        out_shape=jax.ShapeDtypeStruct((b, dim, hidden), mxu_dtype),
        grid_spec=pltpu.PrefetchScalarGridSpec(
            num_scalar_prefetch=0,
            grid=(b, n_tiles),
            in_specs=[
                pl.BlockSpec((None, dim, n_tile), lambda i, j: (i, 0, j)),   # x
                pl.BlockSpec((2 * hidden, dim), lambda i, j: (0, 0)),        # [w_k; w_v]
                pl.BlockSpec((dim, hidden), lambda i, j: (0, 0)),            # w_out*scale
                pl.BlockSpec((hidden, hidden), lambda i, j: (0, 0)),         # block-diag mask
            ],
            out_specs=pl.BlockSpec((None, dim, hidden), lambda i, j: (i, 0, 0)),
            scratch_shapes=[
                pltpu.VMEM((hidden, 1), jnp.float32),        # running max
                pltpu.VMEM((hidden, 1), jnp.float32),        # running sum
                pltpu.VMEM((hidden, hidden), jnp.float32),   # running context
            ],
        ),
        compiler_params=pltpu.CompilerParams(
            dimension_semantics=("parallel", "arbitrary"),
            vmem_limit_bytes=32 * 1024 * 1024),
    )(x_p, w_kv, w_out_s, blk_mask)

    # ---- Pass 2: per n-tile q-softmax, fused projection, RMSNorm ----
    out_kernel = functools.partial(
        _output_kernel, heads=heads, dim_head=dim_head,
        mxu_dtype=mxu_dtype, approx=approx)

    out = pl.pallas_call(
        out_kernel,
        out_shape=jax.ShapeDtypeStruct((b, dim, n_pad), x.dtype),
        grid_spec=pltpu.PrefetchScalarGridSpec(
            num_scalar_prefetch=0,
            grid=(b, n_tiles),
            in_specs=[
                pl.BlockSpec((None, dim, n_tile), lambda i, j: (i, 0, j)),   # x
                pl.BlockSpec((None, dim, hidden), lambda i, j: (i, 0, 0)),   # M
                pl.BlockSpec((hidden, dim), lambda i, j: (0, 0)),            # w_q
                pl.BlockSpec((dim, 2), lambda i, j: (0, 0)),                 # bias|gain
            ],
            out_specs=pl.BlockSpec((None, dim, n_tile), lambda i, j: (i, 0, j)),
        ),
        compiler_params=pltpu.CompilerParams(
            dimension_semantics=("parallel", "parallel"),
            vmem_limit_bytes=32 * 1024 * 1024),
    )(x_p, m_mat, w_q, gb)

    return out[:, :, :n] if n_pad != n else out


def linear_attention_ref(x, w_qkv, w_out, b_out, g, *, heads, dim_head):
    """Pure-JAX reference matching the PyTorch forward."""
    b, dim, n = x.shape
    hidden = heads * dim_head
    scale = dim_head ** -0.5

    qkv = jnp.einsum('oc,bcn->bon', w_qkv, x)                  # (b, 3*hidden, n)
    q, k, v = jnp.split(qkv, 3, axis=1)
    resh = lambda t: t.reshape(b, heads, dim_head, n)
    q, k, v = map(resh, (q, k, v))

    q = jax.nn.softmax(q, axis=-2) * scale
    k = jax.nn.softmax(k, axis=-1)

    context = jnp.einsum('bhdn,bhen->bhde', k, v)
    out = jnp.einsum('bhde,bhdn->bhen', context, q)
    out = out.reshape(b, hidden, n)

    y = jnp.einsum('oc,bcn->bon', w_out, out) + b_out.reshape(1, dim, 1)
    norm = jnp.sqrt(jnp.sum(y * y, axis=1, keepdims=True))
    y_n = y / jnp.maximum(norm, 1e-12)
    return y_n * g.reshape(1, dim, 1) * math.sqrt(float(dim))


if __name__ == "__main__":
    # Small shapes consistent with the module: dim=32, heads=4, dim_head=32.
    # n=200 is NOT a multiple of 128, exercising the pad-and-mask tail path;
    # n_tile=128 on the f32 run exercises the multi-tile flash accumulation.
    batch, dim, n = 2, 32, 200
    heads, dim_head = 4, 32
    hidden = heads * dim_head

    key = jax.random.PRNGKey(0)
    kx, kq, ko, kb, kg = jax.random.split(key, 5)

    x = jax.random.normal(kx, (batch, dim, n), dtype=jnp.float32)
    # Conv1d(dim, 3*hidden, 1, bias=False) weight -> (3*hidden, dim)
    w_qkv = jax.random.normal(kq, (3 * hidden, dim), dtype=jnp.float32) * (1.0 / math.sqrt(dim))
    # Conv1d(hidden, dim, 1) weight/bias
    w_out = jax.random.normal(ko, (dim, hidden), dtype=jnp.float32) * (1.0 / math.sqrt(hidden))
    b_out = jax.random.normal(kb, (dim,), dtype=jnp.float32) * 0.01
    # RMSNorm gain (torch init: ones) -- perturb slightly so it matters
    g = jnp.ones((dim,), dtype=jnp.float32) + 0.1 * jax.random.normal(kg, (dim,), dtype=jnp.float32)

    ref = linear_attention_ref(x, w_qkv, w_out, b_out, g,
                               heads=heads, dim_head=dim_head)

    # f32 MXU operands: reference-accurate path (tight tolerance), multi-tile + tail mask.
    out_f32 = linear_attention_pallas(x, w_qkv, w_out, b_out, g,
                                      heads=heads, dim_head=dim_head,
                                      mxu_dtype=jnp.float32, n_tile=128)
    out_f32 = jax.block_until_ready(out_f32)
    assert out_f32.shape == (batch, dim, n)
    assert jnp.allclose(out_f32, ref, rtol=1e-4, atol=1e-4), \
        f"f32 max err {jnp.max(jnp.abs(out_f32 - ref))}"

    # bf16 MXU operands (default fast path on v5e/v6e/v7x), default (padded) tile:
    # looser tolerance from bf16 operand rounding + approx reciprocal.
    out_bf16 = linear_attention_pallas(x, w_qkv, w_out, b_out, g,
                                       heads=heads, dim_head=dim_head,
                                       mxu_dtype=jnp.bfloat16)
    out_bf16 = jax.block_until_ready(out_bf16)
    assert out_bf16.shape == (batch, dim, n)
    assert jnp.allclose(out_bf16, ref, rtol=1e-1, atol=1e-1), \
        f"bf16 max err {jnp.max(jnp.abs(out_bf16 - ref))}"

    print("KERNEL_OK")
</pallas_src>

<mosaic_0001>
module attributes {stable_mosaic.version = 11 : i64} {
  func.func @_context_kernel(%arg0: i32, %arg1: i32, %arg2: memref<1x32x128xf32, #tpu.memory_space<vmem>>, %arg3: memref<256x32xf32, #tpu.memory_space<vmem>>, %arg4: memref<32x128xf32, #tpu.memory_space<vmem>>, %arg5: memref<128x128xf32, #tpu.memory_space<vmem>>, %arg6: memref<1x32x128xf32, #tpu.memory_space<vmem>>, %arg7: memref<128x1xf32, #tpu.memory_space<vmem>>, %arg8: memref<128x1xf32, #tpu.memory_space<vmem>>, %arg9: memref<128x128xf32, #tpu.memory_space<vmem>>) attributes {dimension_semantics = [#tpu.dimension_semantics<parallel>, #tpu.dimension_semantics<arbitrary>], iteration_bounds = array<i64: 2, 2>, scalar_prefetch = 0 : i64, scratch_operands = 3 : i64, tpu.core_type = #tpu.core_type<tc>, window_params = [{transform_indices = @transform_0, window_bounds = array<i64: 1, 32, 128>}, {pipeline_mode = #tpu.pipeline_mode<synchronous>, transform_indices = @transform_1, window_bounds = array<i64: 256, 32>}, {pipeline_mode = #tpu.pipeline_mode<synchronous>, transform_indices = @transform_2, window_bounds = array<i64: 32, 128>}, {pipeline_mode = #tpu.pipeline_mode<synchronous>, transform_indices = @transform_3, window_bounds = array<i64: 128, 128>}, {transform_indices = @transform_4, window_bounds = array<i64: 1, 32, 128>}]} {
    %c0_i32 = arith.constant 0 : i32
    %0 = arith.cmpi eq, %arg1, %c0_i32 : i32
    %1 = arith.extui %0 : i1 to i32
    %c0_i32_0 = arith.constant 0 : i32
    %2 = arith.cmpi ne, %1, %c0_i32_0 : i32
    scf.if %2 {
      %cst_22 = arith.constant 0xFF800000 : f32
      %44 = vector.broadcast %cst_22 : f32 to vector<128x1xf32>
      %c0_23 = arith.constant 0 : index
      %c0_24 = arith.constant 0 : index
      %45 = vector.load %arg7[%c0_23, %c0_24] : memref<128x1xf32, #tpu.memory_space<vmem>>, vector<128x1xf32>
      tpu.vector_store %arg7[%c0_23, %c0_24], %44 {strides = array<i32>} : memref<128x1xf32, #tpu.memory_space<vmem>>, vector<128x1xf32>,
      %cst_25 = arith.constant 0.000000e+00 : f32
      %46 = vector.broadcast %cst_25 : f32 to vector<128x1xf32>
      %c0_26 = arith.constant 0 : index
      %c0_27 = arith.constant 0 : index
      %47 = vector.load %arg8[%c0_26, %c0_27] : memref<128x1xf32, #tpu.memory_space<vmem>>, vector<128x1xf32>
      tpu.vector_store %arg8[%c0_26, %c0_27], %46 {strides = array<i32>} : memref<128x1xf32, #tpu.memory_space<vmem>>, vector<128x1xf32>,
      %cst_28 = arith.constant 0.000000e+00 : f32
      %48 = vector.broadcast %cst_28 : f32 to vector<128x128xf32>
      %c0_29 = arith.constant 0 : index
      %c0_30 = arith.constant 0 : index
      %49 = vector.load %arg9[%c0_29, %c0_30] : memref<128x128xf32, #tpu.memory_space<vmem>>, vector<128x128xf32>
      tpu.vector_store %arg9[%c0_29, %c0_30], %48 {strides = array<i32>} : memref<128x128xf32, #tpu.memory_space<vmem>>, vector<128x128xf32>,
    } else {
    }
    %c0 = arith.constant 0 : index
    %c0_1 = arith.constant 0 : index
    %c0_2 = arith.constant 0 : index
    %3 = vector.load %arg2[%c0, %c0_1, %c0_2] : memref<1x32x128xf32, #tpu.memory_space<vmem>>, vector<1x32x128xf32>
    %4 = vector.shape_cast %3 : vector<1x32x128xf32> to vector<32x128xf32>
    %c0_3 = arith.constant 0 : index
    %c0_4 = arith.constant 0 : index
    %5 = vector.load %arg3[%c0_3, %c0_4] : memref<256x32xf32, #tpu.memory_space<vmem>>, vector<256x32xf32>
    %cst = arith.constant dense<0.000000e+00> : vector<256x128xf32>
    %6 = tpu.matmul %5, %4, %cst {dimension_numbers = #tpu.dot_dimension_numbers<[1], [0], [0], [1], [0, 0, 1, 1], [], []>} : vector<256x32xf32>, vector<32x128xf32>, vector<256x128xf32> -> vector<256x128xf32>
    %7 = vector.extract_strided_slice %6 {offsets = [0, 0], sizes = [128, 128], strides = [1, 1]} : vector<256x128xf32> to vector<128x128xf32>
    %8 = vector.extract_strided_slice %6 {offsets = [128, 0], sizes = [128, 128], strides = [1, 1]} : vector<256x128xf32> to vector<128x128xf32>
    %9 = tpu.iota {dimensions = array<i32: 1>} : vector<1x128xi32>
    %c128_i32 = arith.constant 128 : i32
    %10 = arith.muli %arg1, %c128_i32 : i32
    %11 = vector.broadcast %10 : i32 to vector<1x128xi32>
    %12 = arith.addi %9, %11 : vector<1x128xi32>
    %c200_i32 = arith.constant 200 : i32
    %13 = vector.broadcast %c200_i32 : i32 to vector<1x128xi32>
    %14 = arith.cmpi slt, %12, %13 : vector<1x128xi32>
    %cst_5 = arith.constant -1.000000e+30 : f32
    %15 = vector.shape_cast %14 : vector<1x128xi1> to vector<1x128xi1>
    %16 = vector.broadcast %15 : vector<1x128xi1> to vector<128x128xi1>
    %17 = vector.broadcast %cst_5 : f32 to vector<128x128xf32>
    %18 = arith.select %16, %7, %17 : vector<128x128xi1>, vector<128x128xf32>
    %c0_6 = arith.constant 0 : index
    %c0_7 = arith.constant 0 : index
    %19 = vector.load %arg7[%c0_6, %c0_7] : memref<128x1xf32, #tpu.memory_space<vmem>>, vector<128x1xf32>
    %cst_8 = arith.constant dense<0xFF800000> : vector<128xf32>
    %20 = vector.multi_reduction <maximumf>, %18, %cst_8 [1] : vector<128x128xf32> to vector<128xf32>
    %21 = vector.shape_cast %20 : vector<128xf32> to vector<128x1xf32>
    %22 = arith.maximumf %19, %21 : vector<128x1xf32>
    %23 = arith.subf %19, %22 : vector<128x1xf32>
    %24 = math.exp %23 : vector<128x1xf32>
    %25 = vector.broadcast %22 : vector<128x1xf32> to vector<128x128xf32>
    %26 = arith.subf %18, %25 : vector<128x128xf32>
    %27 = math.exp %26 : vector<128x128xf32>
    %c0_9 = arith.constant 0 : index
    %c0_10 = arith.constant 0 : index
    %28 = vector.load %arg8[%c0_9, %c0_10] : memref<128x1xf32, #tpu.memory_space<vmem>>, vector<128x1xf32>
    %29 = arith.mulf %24, %28 : vector<128x1xf32>
    %cst_11 = arith.constant dense<0.000000e+00> : vector<128xf32>
    %30 = vector.multi_reduction <add>, %27, %cst_11 [1] : vector<128x128xf32> to vector<128xf32>
    %31 = vector.shape_cast %30 : vector<128xf32> to vector<128x1xf32>
    %32 = arith.addf %29, %31 : vector<128x1xf32>
    %c0_12 = arith.constant 0 : index
    %c0_13 = arith.constant 0 : index
    %33 = vector.load %arg8[%c0_12, %c0_13] : memref<128x1xf32, #tpu.memory_space<vmem>>, vector<128x1xf32>
    tpu.vector_store %arg8[%c0_12, %c0_13], %32 {strides = array<i32>} : memref<128x1xf32, #tpu.memory_space<vmem>>, vector<128x1xf32>,
    %cst_14 = arith.constant dense<0.000000e+00> : vector<128x128xf32>
    %34 = tpu.matmul %27, %8, %cst_14 {dimension_numbers = #tpu.dot_dimension_numbers<[1], [1], [0], [0], [0, 0, 1, 0], [], []>} : vector<128x128xf32>, vector<128x128xf32>, vector<128x128xf32> -> vector<128x128xf32>
    %c0_15 = arith.constant 0 : index
    %c0_16 = arith.constant 0 : index
    %35 = vector.load %arg9[%c0_15, %c0_16] : memref<128x128xf32, #tpu.memory_space<vmem>>, vector<128x128xf32>
    %36 = vector.broadcast %24 : vector<128x1xf32> to vector<128x128xf32>
    %37 = arith.mulf %36, %35 : vector<128x128xf32>
    %38 = arith.addf %37, %34 : vector<128x128xf32>
    %c0_17 = arith.constant 0 : index
    %c0_18 = arith.constant 0 : index
    %39 = vector.load %arg9[%c0_17, %c0_18] : memref<128x128xf32, #tpu.memory_space<vmem>>, vector<128x128xf32>
    tpu.vector_store %arg9[%c0_17, %c0_18], %38 {strides = array<i32>} : memref<128x128xf32, #tpu.memory_space<vmem>>, vector<128x128xf32>,
    %c0_19 = arith.constant 0 : index
    %c0_20 = arith.constant 0 : index
    %40 = vector.load %arg7[%c0_19, %c0_20] : memref<128x1xf32, #tpu.memory_space<vmem>>, vector<128x1xf32>
    tpu.vector_store %arg7[%c0_19, %c0_20], %22 {strides = array<i32>} : memref<128x1xf32, #tpu.memory_space<vmem>>, vector<128x1xf32>,
    %c1_i32 = arith.constant 1 : i32
    %41 = arith.cmpi eq, %arg1, %c1_i32 : i32
    %42 = arith.extui %41 : i1 to i32
    %c0_i32_21 = arith.constant 0 : i32
    %43 = arith.cmpi ne, %42, %c0_i32_21 : i32
    scf.if %43 {
      %c0_22 = arith.constant 0 : index
      %c0_23 = arith.constant 0 : index
      %44 = vector.load %arg9[%c0_22, %c0_23] : memref<128x128xf32, #tpu.memory_space<vmem>>, vector<128x128xf32>
      %c0_24 = arith.constant 0 : index
      %c0_25 = arith.constant 0 : index
      %45 = vector.load %arg8[%c0_24, %c0_25] : memref<128x1xf32, #tpu.memory_space<vmem>>, vector<128x1xf32>
      %46 = tpu.reciprocal %45 : vector<128x1xf32> -> vector<128x1xf32>
      %47 = vector.broadcast %46 : vector<128x1xf32> to vector<128x128xf32>
      %48 = arith.mulf %44, %47 : vector<128x128xf32>
      %c0_26 = arith.constant 0 : index
      %c0_27 = arith.constant 0 : index
      %49 = vector.load %arg5[%c0_26, %c0_27] : memref<128x128xf32, #tpu.memory_space<vmem>>, vector<128x128xf32>
      %50 = arith.mulf %48, %49 : vector<128x128xf32>
      %c0_28 = arith.constant 0 : index
      %c0_29 = arith.constant 0 : index
      %51 = vector.load %arg4[%c0_28, %c0_29] : memref<32x128xf32, #tpu.memory_space<vmem>>, vector<32x128xf32>
      %cst_30 = arith.constant dense<0.000000e+00> : vector<32x128xf32>
      %52 = tpu.matmul %51, %50, %cst_30 {dimension_numbers = #tpu.dot_dimension_numbers<[1], [1], [0], [0], [0, 0, 1, 0], [], []>} : vector<32x128xf32>, vector<128x128xf32>, vector<32x128xf32> -> vector<32x128xf32>
      %c0_31 = arith.constant 0 : index
      %c0_32 = arith.constant 0 : index
      %c0_33 = arith.constant 0 : index
      %53 = vector.load %arg6[%c0_31, %c0_32, %c0_33] : memref<1x32x128xf32, #tpu.memory_space<vmem>>, vector<1x32x128xf32>
      %54 = vector.shape_cast %53 : vector<1x32x128xf32> to vector<32x128xf32>
      %55 = vector.shape_cast %52 : vector<32x128xf32> to vector<1x32x128xf32>
      tpu.vector_store %arg6[%c0_31, %c0_32, %c0_33], %55 {strides = array<i32>} : memref<1x32x128xf32, #tpu.memory_space<vmem>>, vector<1x32x128xf32>,
    } else {
    }
    return
  }
  func.func @transform_0(%arg0: i32, %arg1: i32) -> (i32, i32, i32) {
    %c0_i32 = arith.constant 0 : i32
    %c0_i32_0 = arith.constant 0 : i32
    return %arg0, %c0_i32, %arg1 : i32, i32, i32
  }
  func.func @transform_1(%arg0: i32, %arg1: i32) -> (i32, i32) {
    %c0_i32 = arith.constant 0 : i32
    %c0_i32_0 = arith.constant 0 : i32
    %c0_i32_1 = arith.constant 0 : i32
    return %c0_i32, %c0_i32_0 : i32, i32
  }
  func.func @transform_2(%arg0: i32, %arg1: i32) -> (i32, i32) {
    %c0_i32 = arith.constant 0 : i32
    %c0_i32_0 = arith.constant 0 : i32
    %c0_i32_1 = arith.constant 0 : i32
    return %c0_i32, %c0_i32_0 : i32, i32
  }
  func.func @transform_3(%arg0: i32, %arg1: i32) -> (i32, i32) {
    %c0_i32 = arith.constant 0 : i32
    %c0_i32_0 = arith.constant 0 : i32
    %c0_i32_1 = arith.constant 0 : i32
    return %c0_i32, %c0_i32_0 : i32, i32
  }
  func.func @transform_4(%arg0: i32, %arg1: i32) -> (i32, i32, i32) {
    %c0_i32 = arith.constant 0 : i32
    %c0_i32_0 = arith.constant 0 : i32
    %c0_i32_1 = arith.constant 0 : i32
    return %arg0, %c0_i32, %c0_i32_0 : i32, i32, i32
  }
}

</mosaic_0001>

<bundles_post_ra>
// kernel: tpu_custom_call.1
= control target key start
LH: loop header
LB: loop body
LE: loop exit
PB: predicated region body
PF: predicated region fallthrough
CT: control target
= control target key end

     0   :  { %9 = vsyncpa [#allocation7], 0  ;;  %s3181_s0 = inlined_call_operand.vmem [shape: f32[2,32,256], index: 0, kind: input, shape index: {}]   ;;  %s3182_s1 = inlined_call_operand.vmem [shape: f32[256,32], index: 1, kind: input, shape index: {}]   ;;  %s3183_s2 = inlined_call_operand.vmem [shape: f32[32,128], index: 2, kind: input, shape index: {}]   ;;  %s3184_s3 = inlined_call_operand.vmem [shape: f32[128,128], index: 3, kind: input, shape index: {}]   ;;  %s3185_s4 = inlined_call_operand.hbm [shape: f32[2,32,128], index: 4, kind: output, shape index: {}]  }
   0x1   :  { %11 = vsyncpa [#allocation7 + $0x1], 0  ;;  %s2433_s15 = smov 0   ;;  %s2435_s16 = smov 0  }
   0x2   :  { %s2437_s17 = smov 0   ;;  %s2439_s18 = smov 0  }
   0x3   :  { %s2441_s19 = smov 0   ;;  %s2443_s20 = smov 0  }
   0x4   :  { %s2445_s21 = smov 0   ;;  %s2447_s22 = smov 0  }
   0x5   :  { %s2449_s23 = smov 0   ;;  %s2451_s24 = smov 0  }
   0x6 LB: > { %s1703_s25 = sadd.s32 4294967295, %s2399_s24   ;;  %s1704_s26 = sadd.s32 4294967294, %s2399_s24   ;;  %s2399_s24 = sphi %s2451_s24, %s17_s24   ;;  %s2395_s23 = sphi %s2449_s23, %s3199_s23   ;;  %s2391_s22 = sphi %s2447_s22, %s3198_s22   ;;  %s2387_s21 = sphi %s2445_s21, %s3197_s21   ;;  %s2383_s20 = sphi %s2443_s20, %s3196_s20   ;;  %s2379_s19 = sphi %s2441_s19, %s3195_s19   ;;  %s2375_s18 = sphi %s2439_s18, %s3194_s18   ;;  %s2371_s17 = sphi %s2437_s17, %s3193_s17   ;;  %s2367_s16 = sphi %s2435_s16, %s3192_s16   ;;  %s2363_s15 = sphi %s2433_s15, %s3191_s15  }
   0x7   : > { %s26_s27 = sadd.s32 1, %s2391_s22  ;;  %s29_s28 = sadd.s32 1, %s2395_s23 }
   0x8   : > { %p27_p0 = scmp.ge.s32.totalorder %s26_s27, 2  ;;  %s38_s29 = sadd.s32 1, %s2379_s19 }
   0x9   : > { %p45_p1 = scmp.ne.s32.totalorder %s2379_s19, %s2375_s18  ;;  %p46_p2 = scmp.eq.s32.totalorder %s2399_s24, 0 }
   0xa   : > { %s3201_s27 = smov (%p27_p0, %s26_s27), 0  ;;  %s3203_s28 = smov (!%p27_p0, %s29_s28), %s2395_s23 }
   0xb   : > { %s34_s30 = ssub.s32 %s2391_s22, %s3201_s27  ;;  %p2496_p3 = por %p46_p2, %p45_p1 }
   0xc   : > { %p31_p4 = scmp.ge.s32.totalorder %s3203_s28, 2  ;;  %s127_s6 = sadd.s32 1, %s2371_s17 }
   0xd   : > { %p137_p5 = scmp.ne.s32.totalorder %s2371_s17, %s2367_s16  ;;  %p138_p6 = scmp.eq.s32.totalorder %s1703_s25, 3 }
   0xe   : > { %s3205_s28 = smov (%p31_p4, %s3203_s28), 0  ;;  %p143_p8 = scmp.ne.s32.totalorder %s2367_s16, %s2363_s15 }
   0xf   : > { %p2505_p7 = por %p138_p6, %p137_p5  ;;  %s33_s8 = ssub.s32 %s2395_s23, %s3205_s28 }
  0x10   : > { %p144_p9 = scmp.eq.s32.totalorder %s1704_s26, 3  ;;  %s35_s9 = sor.u32 %s34_s30, %s33_s8 }
  0x11   : > { %p125_p10 = scmp.eq.s32.totalorder %s33_s8, 0  ;;  %p36_p11 = scmp.eq.s32.totalorder %s35_s9, 0 }
  0x12   : > { %p2513_p12 = por %p144_p9, %p143_p8  ;;  %p1706_p13 = scmp.ge.s32.totalorder %s2399_s24, 4 }
  0x13   : > { %s2518_s11 = scalar_select %p125_p10, %s2371_s17, %s127_s6  }
  0x14   : > { %s2521_s12 = scalar_select %p36_p11, %s2379_s19, %s38_s29  }
  0x15   : > { %169 = sbr.rel (%p1706_p13) target bundleno = 36 (0x24), region = 28 }
  0x1c   : > { %172 = sbr.rel (!%p2496_p3) target bundleno = 36 (0x24), region = 32  ;;  %s174_s13 = sand.u32 (%p2496_p3), 1, %s2379_s19  }
  0x1d   : > { %s1708_s14 = sshll.u32 (%p2496_p3), %s2395_s23, 3  ;;  %s1707_s25 = sshll.u32 (%p2496_p3), %s174_s13, 5 }
  0x1e   : > { %s178_s26 = sadd.s32 (%p2496_p3), %s2391_s22, %s1708_s14  ;;  %s176_s29 = scalar_lea.vmem (%p2496_p3), [#allocation5], %s1707_s25 }
  0x1f   : > { %s1709_s30 = sshll.u32 (%p2496_p3), %s178_s26, 3 }
  0x20   : > { %s180_s6 = scalar_lea.vmem (%p2496_p3), %s3181_s0, %s1709_s30 }
  0x21   : > { %v214_v0 = vld [vmem:[%s180_s6] sm:$0xff] (%p2496_p3)  ;;  %v216_v1 = vld [vmem:[%s180_s6 + $0x10] sm:$0xff] (%p2496_p3) }
  0x22   : > { %v218_v2 = vld [vmem:[%s180_s6 + $0x20] sm:$0xff] (%p2496_p3)  ;;  %215 = vst [vmem:[%s176_s29] sm:$0xff] (%p2496_p3), %v214_v0  ;;  %217 = vst [vmem:[%s176_s29 + $0x8] sm:$0xff] (%p2496_p3), %v216_v1  ;;  %v220_v3 = vld [vmem:[%s180_s6 + $0x30] sm:$0xff] (%p2496_p3) }
  0x23   : > { %219 = vst [vmem:[%s176_s29 + $0x10] sm:$0xff] %v218_v2  ;;  %221 = vst [vmem:[%s176_s29 + $0x18] sm:$0xff] %v220_v3 }
  0x24 PF: > { %p1710_p0 = scmp.ge.s32.totalorder %s2399_s24, 1  ;;  %p226_p1 = scmp.lt.s32.totalorder %s2399_s24, 5 }
  0x26   : > { %p227_p2 = pnand %p1710_p0, %p226_p1 }
  0x27   : > { %s233_s5 = sand.u32 (!%p227_p2), 1, %s2375_s18   ;;  %s3186_s13 = sand.u32 (!%p227_p2), 1, %s2367_s16  }
  0x28   : > { %230 = sbr.rel (%p227_p2) target bundleno = 1268 (0x4f4), region = 70  ;;  %s1711_s14 = sshll.u32 (!%p227_p2), %s233_s5, 5 }
  0x29   : > { %s1712_s25 = sshll.u32 (!%p227_p2), %s3186_s13, 5  ;;  %s2538_s26 = scalar_lea.vmem (!%p227_p2), [#allocation5], %s1711_s14 }
  0x2a   : > { %s2540_s30 = scalar_lea.vmem (!%p227_p2), [#allocation6], %s1712_s25  ;;  %p1713_p3 = scmp.ne.s32.totalorder (!%p227_p2), %s2383_s20, 0 }
  0x2f   : > { %261 = sbr.rel (%p1713_p3) target bundleno = 72 (0x48), region = 78  ;;  %vm262_vm0 = vcmask (!%p1713_p3), 7168   ;;  %v2401_v4 = vmov (!%p1713_p3), -inf   ;;  %v2402_v5 = vmov (!%p1713_p3), 0.0  }
  0x30   : > { %263 = vst.msk [vmem:[#allocation2] sm:$0xff] (!%p1713_p3), %vm262_vm0, %v2401_v4  ;;  %264 = vst.msk [vmem:[#allocation2 + $0x8] sm:$0xff] (!%p1713_p3), %vm262_vm0, %v2401_v4 }
  0x31   : > { %265 = vst.msk [vmem:[#allocation2 + $0x10] sm:$0xff] (!%p1713_p3), %vm262_vm0, %v2401_v4  ;;  %266 = vst.msk [vmem:[#allocation2 + $0x18] sm:$0xff] (!%p1713_p3), %vm262_vm0, %v2401_v4 }
  0x32   : > { %267 = vst.msk [vmem:[#allocation2 + $0x20] sm:$0xff] (!%p1713_p3), %vm262_vm0, %v2401_v4  ;;  %268 = vst.msk [vmem:[#allocation2 + $0x28] sm:$0xff] (!%p1713_p3), %vm262_vm0, %v2401_v4 }
  0x33   : > { %269 = vst.msk [vmem:[#allocation2 + $0x30] sm:$0xff] (!%p1713_p3), %vm262_vm0, %v2401_v4  ;;  %270 = vst.msk [vmem:[#allocation2 + $0x38] sm:$0xff] (!%p1713_p3), %vm262_vm0, %v2401_v4 }
  0x34   : > { %271 = vst.msk [vmem:[#allocation2 + $0x40] sm:$0xff] (!%p1713_p3), %vm262_vm0, %v2401_v4  ;;  %272 = vst.msk [vmem:[#allocation2 + $0x48] sm:$0xff] (!%p1713_p3), %vm262_vm0, %v2401_v4 }
  0x35   : > { %273 = vst.msk [vmem:[#allocation2 + $0x50] sm:$0xff] (!%p1713_p3), %vm262_vm0, %v2401_v4  ;;  %274 = vst.msk [vmem:[#allocation2 + $0x58] sm:$0xff] (!%p1713_p3), %vm262_vm0, %v2401_v4 }
  0x36   : > { %275 = vst.msk [vmem:[#allocation2 + $0x60] sm:$0xff] %vm262_vm0, %v2401_v4  ;;  %276 = vst.msk [vmem:[#allocation2 + $0x68] sm:$0xff] %vm262_vm0, %v2401_v4 }
  0x37   : > { %277 = vst.msk [vmem:[#allocation2 + $0x70] sm:$0xff] %vm262_vm0, %v2401_v4  ;;  %278 = vst.msk [vmem:[#allocation2 + $0x78] sm:$0xff] %vm262_vm0, %v2401_v4 }
  0x38   : > { %279 = vst.msk [vmem:[#allocation3] sm:$0xff] %vm262_vm0, %v2402_v5  ;;  %280 = vst.msk [vmem:[#allocation3 + $0x8] sm:$0xff] %vm262_vm0, %v2402_v5 }
  0x39   : > { %281 = vst.msk [vmem:[#allocation3 + $0x10] sm:$0xff] %vm262_vm0, %v2402_v5  ;;  %282 = vst.msk [vmem:[#allocation3 + $0x18] sm:$0xff] %vm262_vm0, %v2402_v5 }
  0x3a   : > { %283 = vst.msk [vmem:[#allocation3 + $0x20] sm:$0xff] %vm262_vm0, %v2402_v5  ;;  %284 = vst.msk [vmem:[#allocation3 + $0x28] sm:$0xff] %vm262_vm0, %v2402_v5 }
  0x3b   : > { %285 = vst.msk [vmem:[#allocation3 + $0x30] sm:$0xff] %vm262_vm0, %v2402_v5  ;;  %286 = vst.msk [vmem:[#allocation3 + $0x38] sm:$0xff] %vm262_vm0, %v2402_v5 }
  0x3c   : > { %287 = vst.msk [vmem:[#allocation3 + $0x40] sm:$0xff] %vm262_vm0, %v2402_v5  ;;  %288 = vst.msk [vmem:[#allocation3 + $0x48] sm:$0xff] %vm262_vm0, %v2402_v5 }
  0x3d   : > { %289 = vst.msk [vmem:[#allocation3 + $0x50] sm:$0xff] %vm262_vm0, %v2402_v5  ;;  %290 = vst.msk [vmem:[#allocation3 + $0x58] sm:$0xff] %vm262_vm0, %v2402_v5 }
  0x3e   : > { %291 = vst.msk [vmem:[#allocation3 + $0x60] sm:$0xff] %vm262_vm0, %v2402_v5  ;;  %292 = vst.msk [vmem:[#allocation3 + $0x68] sm:$0xff] %vm262_vm0, %v2402_v5 }
  0x3f   : > { %293 = vst.msk [vmem:[#allocation3 + $0x70] sm:$0xff] %vm262_vm0, %v2402_v5  ;;  %294 = vst.msk [vmem:[#allocation3 + $0x78] sm:$0xff] %vm262_vm0, %v2402_v5 }
  0x40   : > { %295 = vst [vmem:[#allocation4] sm:$0xff] %v2402_v5  ;;  %296 = vst [vmem:[#allocation4 + $0x8] sm:$0xff] %v2402_v5 }
  0x41   : > { %297 = vst [vmem:[#allocation4 + $0x10] sm:$0xff] %v2402_v5  ;;  %298 = vst [vmem:[#allocation4 + $0x18] sm:$0xff] %v2402_v5 }
  0x42   : > { %299 = vst [vmem:[#allocation4 + $0x20] sm:$0xff] %v2402_v5  ;;  %300 = vst [vmem:[#allocation4 + $0x28] sm:$0xff] %v2402_v5 }
  0x43   : > { %301 = vst [vmem:[#allocation4 + $0x30] sm:$0xff] %v2402_v5  ;;  %302 = vst [vmem:[#allocation4 + $0x38] sm:$0xff] %v2402_v5 }
  0x44   : > { %303 = vst [vmem:[#allocation4 + $0x40] sm:$0xff] %v2402_v5  ;;  %304 = vst [vmem:[#allocation4 + $0x48] sm:$0xff] %v2402_v5 }
  0x45   : > { %305 = vst [vmem:[#allocation4 + $0x50] sm:$0xff] %v2402_v5  ;;  %306 = vst [vmem:[#allocation4 + $0x58] sm:$0xff] %v2402_v5 }
  0x46   : > { %307 = vst [vmem:[#allocation4 + $0x60] sm:$0xff] %v2402_v5  ;;  %308 = vst [vmem:[#allocation4 + $0x68] sm:$0xff] %v2402_v5 }
  0x47   : > { %309 = vst [vmem:[#allocation4 + $0x70] sm:$0xff] %v2402_v5  ;;  %310 = vst [vmem:[#allocation4 + $0x78] sm:$0xff] %v2402_v5 }
  0x48 PF: > { %v311_v6 = vld [vmem:[%s2538_s26] sm:$0xff]  ;;  %v312_v7 = vld [vmem:[%s2538_s26 + $0x8] sm:$0xff]  ;;  %v313_v8 = vld [vmem:[%s2538_s26 + $0x10] sm:$0xff]  ;;  %vm347_vm1 = vcmask 261120   ;;  %v669_v44 = vlaneseq  ;;  %s1746_s13 = sshll.u32 %s2383_s20, 7  ;;  %vm1013_vm3 = vcmask 7168  }
  0x49   : > { %v1992_v9 = vpack.c.bf16 %v312_v7, %v311_v6  ;;  %v314_v10 = vld [vmem:[%s2538_s26 + $0x18] sm:$0xff]  ;;  %v315_v11 = vld [vmem:[%s3182_s1] sm:$0xff]  ;;  %v316_v13 = vld [vmem:[%s3182_s1 + $0x8] sm:$0xff]  ;;  %v672_v46 = vstv %s1746_s13  ;;  %p1747_p4 = scmp.ne.s32.totalorder %s2383_s20, 1 }
  0x4a   : > { %v1996_v12 = vpack.c.bf16 %v314_v10, %v313_v8  ;;  %1850 = vmatprep.mubr.msk.f32.mxu0 %vm347_vm1, %v315_v11  ;;  %v317_v14 = vld [vmem:[%s3182_s1 + $0x10] sm:$0xff]  ;;  %v318_v15 = vld [vmem:[%s3182_s1 + $0x18] sm:$0xff]  ;;  %v319_v16 = vld [vmem:[%s3182_s1 + $0x20] sm:$0xff]  ;;  %v670_v45 = vand.u32 127, %v669_v44  ;;  %v2403_v10 = vmov 0  }
  0x4b   : > { %1993 = vmatprep.subr.bf16.mxu0 %v1992_v9  ;;  %v320_v17 = vld [vmem:[%s3182_s1 + $0x28] sm:$0xff]  ;;  %v321_v18 = vld [vmem:[%s3182_s1 + $0x30] sm:$0xff]  ;;  %v322_v19 = vld [vmem:[%s3182_s1 + $0x38] sm:$0xff]  ;;  %2190 = vset.pattern.permute.xlu1 %v2403_v10 }
  0x4c   : > { %1995 = vmatpush3.bf16.msra.mxu0 %v1992_v9  ;;  %v323_v20 = vld [vmem:[%s3182_s1 + $0x40] sm:$0xff]  ;;  %v324_v21 = vld [vmem:[%s3182_s1 + $0x48] sm:$0xff]  ;;  %v325_v22 = vld [vmem:[%s3182_s1 + $0x50] sm:$0xff]  ;;  %v673_v47 = vadd.s32 %v672_v46, %v670_v45  ;;  %2189 = vset.pattern.permute.xlu0 %v2403_v10 }
  0x4d   : > { %1997 = vmatprep.subr.bf16.mxu0 %v1996_v12  ;;  %v326_v23 = vld [vmem:[%s3182_s1 + $0x58] sm:$0xff]  ;;  %v327_v24 = vld [vmem:[%s3182_s1 + $0x60] sm:$0xff]  ;;  %v328_v25 = vld [vmem:[%s3182_s1 + $0x68] sm:$0xff] }
  0x4e   : > { %v329_v26 = vld [vmem:[%s3182_s1 + $0x70] sm:$0xff]  ;;  %v330_v27 = vld [vmem:[%s3182_s1 + $0x78] sm:$0xff]  ;;  %v331_v28 = vld [vmem:[%s3182_s1 + $0x80] sm:$0xff]  ;;  %vm674_vm2 = vcmp.lt.s32.totalorder %v673_v47, 200 }
  0x4f   : > { %v332_v29 = vld [vmem:[%s3182_s1 + $0x88] sm:$0xff]  ;;  %v333_v30 = vld [vmem:[%s3182_s1 + $0x90] sm:$0xff]  ;;  %v334_v31 = vld [vmem:[%s3182_s1 + $0x98] sm:$0xff] }
  0x50   : > { %1999 = vmatpush3.bf16.msra.mxu0 %v1996_v12  ;;  %v335_v32 = vld [vmem:[%s3182_s1 + $0xa0] sm:$0xff]  ;;  %v336_v33 = vld [vmem:[%s3182_s1 + $0xa8] sm:$0xff]  ;;  %v337_v34 = vld [vmem:[%s3182_s1 + $0xb0] sm:$0xff] }
  0x51   : > { %v338_v35 = vld [vmem:[%s3182_s1 + $0xb8] sm:$0xff]  ;;  %v339_v36 = vld [vmem:[%s3182_s1 + $0xc0] sm:$0xff]  ;;  %v340_v37 = vld [vmem:[%s3182_s1 + $0xc8] sm:$0xff] }
  0x52   : > { %v341_v38 = vld [vmem:[%s3182_s1 + $0xd0] sm:$0xff]  ;;  %v342_v39 = vld [vmem:[%s3182_s1 + $0xd8] sm:$0xff]  ;;  %v343_v40 = vld [vmem:[%s3182_s1 + $0xe0] sm:$0xff] }
  0x53   : > { %1851 = vmatmul.mubr.msk.f32.vlgmr.msra.gmra.mrb[0].mxu0 %vm347_vm1, %v316_v13  ;;  %v344_v41 = vld [vmem:[%s3182_s1 + $0xe8] sm:$0xff]  ;;  %v345_v42 = vld [vmem:[%s3182_s1 + $0xf0] sm:$0xff]  ;;  %v346_v43 = vld [vmem:[%s3182_s1 + $0xf8] sm:$0xff] }
  0x54   : > { %1853 = vmatprep.mubr.msk.f32.mxu0 %vm347_vm1, %v317_v14  ;;  %v2822_v10 = vld [vmem:[#allocation2 + $0x50] sm:$0xff] }
  0x57   : > { %1854 = vmatmul.mubr.msk.f32.gmra.mrb[2].mxu0 %vm347_vm1, %v318_v15 }
  0x58   : > { %1856 = vmatprep.mubr.msk.f32.mxu0 %vm347_vm1, %v319_v16 }
  0x5b   : > { %1857 = vmatmul.mubr.msk.f32.gmra.mrb[4].mxu0 %vm347_vm1, %v320_v17 }
  0x5c   : > { %1859 = vmatprep.mubr.msk.f32.mxu0 %vm347_vm1, %v321_v18 }
  0x5f   : > { %1860 = vmatmul.mubr.msk.f32.gmra.mrb[6].mxu0 %vm347_vm1, %v322_v19 }
  0x60   : > { %1862 = vmatprep.mubr.msk.f32.mxu0 %vm347_vm1, %v323_v20 }
  0x63   : > { %1863 = vmatmul.mubr.msk.f32.gmra.mrb[8].mxu0 %vm347_vm1, %v324_v21 }
  0x64   : > { %1865 = vmatprep.mubr.msk.f32.mxu0 %vm347_vm1, %v325_v22 }
  0x67   : > { %1866 = vmatmul.mubr.msk.f32.gmra.mrb[10].mxu0 %vm347_vm1, %v326_v23 }
  0x68   : > { %1868 = vmatprep.mubr.msk.f32.mxu0 %vm347_vm1, %v327_v24 }
  0x6b   : > { %1869 = vmatmul.mubr.msk.f32.gmra.mrb[12].mxu0 %vm347_vm1, %v328_v25 }
  0x6c   : > { %1871 = vmatprep.mubr.msk.f32.mxu0 %vm347_vm1, %v329_v26 }
  0x6f   : > { %1872 = vmatmul.mubr.msk.f32.gmra.mrb[14].mxu0 %vm347_vm1, %v330_v27 }
  0x70   : > { %1874 = vmatprep.mubr.msk.f32.mxu0 %vm347_vm1, %v331_v28 }
  0x73   : > { %1875 = vmatmul.mubr.msk.f32.gmra.mrb[16].mxu0 %vm347_vm1, %v332_v29 }
  0x74   : > { %1877 = vmatprep.mubr.msk.f32.mxu0 %vm347_vm1, %v333_v30 }
  0x77   : > { %1878 = vmatmul.mubr.msk.f32.gmra.mrb[18].mxu0 %vm347_vm1, %v334_v31 }
  0x78   : > { %1880 = vmatprep.mubr.msk.f32.mxu0 %vm347_vm1, %v335_v32 }
  0x7b   : > { %1881 = vmatmul.mubr.msk.f32.gmra.mrb[20].mxu0 %vm347_vm1, %v336_v33 }
  0x7c   : > { %1883 = vmatprep.mubr.msk.f32.mxu0 %vm347_vm1, %v337_v34 }
  0x7f   : > { %1884 = vmatmul.mubr.msk.f32.gmra.mrb[22].mxu0 %vm347_vm1, %v338_v35  ;;  %v2772_v35 = vld [vmem:[#allocation2] sm:$0xff] }
  0x80   : > { %1886 = vmatprep.mubr.msk.f32.mxu0 %vm347_vm1, %v339_v36 }
  0x83   : > { %1887 = vmatmul.mubr.msk.f32.gmra.mrb[24].mxu0 %vm347_vm1, %v340_v37 }
  0x84   : > { %1889 = vmatprep.mubr.msk.f32.mxu0 %vm347_vm1, %v341_v38  ;;  %v2779_v38 = vld [vmem:[#allocation2 + $0x38] sm:$0xff] }
  0x87   : > { %1890 = vmatmul.mubr.msk.f32.gmra.mrb[26].mxu0 %vm347_vm1, %v342_v39 }
  0x88   : > { %1892 = vmatprep.mubr.msk.f32.mxu0 %vm347_vm1, %v343_v40 }
  0x8b   : > { %1893 = vmatmul.mubr.msk.f32.gmra.mrb[28].mxu0 %vm347_vm1, %v344_v41  ;;  %v2784_v41 = vld [vmem:[#allocation2 + $0x30] sm:$0xff] }
  0x8c   : > { %1895 = vmatprep.mubr.msk.f32.mxu0 %vm347_vm1, %v345_v42  ;;  %v2786_v42 = vld [vmem:[#allocation2 + $0x48] sm:$0xff] }
  0x8f   : > { %1896 = vmatmul.mubr.msk.f32.gmra.mrb[30].mxu0 %vm347_vm1, %v346_v43 }
 0x126   : > { %v1852_v48 = vpop.f32.mrb[0].mxu0 }
 0x127   : > { %v510_v49 = vpop.f32.mrb[1].mxu0  ;;  %v2728_v0 = vsel %vm674_vm2, %v1852_v48, -1e+30  ;;  %v2797_v48 = vld [vmem:[#allocation2 + $0x8] sm:$0xff] }
 0x128   : > { %v2709_v50 = vsel %vm674_vm2, %v510_v49, -1e+30  ;;  %v2799_v49 = vld [vmem:[#allocation2 + $0x40] sm:$0xff] }
 0x129   : > { %709 = vmax.xlane.f32.xlu0 %v2709_v50 }
 0x12a   : > { %v1855_v51 = vpop.f32.mrb[2].mxu0 }
 0x12b   : > { %v520_v52 = vpop.f32.mrb[3].mxu0  ;;  %v2744_v8 = vsel %vm674_vm2, %v1855_v51, -1e+30 }
 0x12c   : > { %v2736_v4 = vsel %vm674_vm2, %v520_v52, -1e+30 }
 0x12e   : > { %v1858_v53 = vpop.f32.mrb[4].mxu0 }
 0x12f   : > { %v530_v54 = vpop.f32.mrb[5].mxu0  ;;  %v2760_v14 = vsel %vm674_vm2, %v1858_v53, -1e+30 }
 0x130   : > { %v2752_v12 = vsel %vm674_vm2, %v530_v54, -1e+30 }
 0x132   : > { %v1861_v55 = vpop.f32.mrb[6].mxu0 }
 0x133   : > { %v540_v56 = vpop.f32.mrb[7].mxu0  ;;  %v2713_v57 = vsel %vm674_vm2, %v1861_v55, -1e+30 }
 0x134   : > { %723 = vmax.xlane.f32.xlu0 %v2713_v57  ;;  %v2717_v59 = vsel %vm674_vm2, %v540_v56, -1e+30 }
 0x136   : > { %v1864_v58 = vpop.f32.mrb[8].mxu0 }
 0x137   : > { %v2720_v60 = vsel %vm674_vm2, %v1864_v58, -1e+30  ;;  %v550_v61 = vpop.f32.mrb[9].mxu0  ;;  %v2811_v58 = vld [vmem:[#allocation2 + $0x10] sm:$0xff] }
 0x138   : > { %721 = vmax.xlane.f32.xlu0 %v2717_v59  ;;  %727 = vmax.xlane.f32.xlu1 %v2720_v60  ;;  %v2725_v62 = vsel %vm674_vm2, %v550_v61, -1e+30  ;;  %v2813_v61 = vld [vmem:[#allocation2 + $0x58] sm:$0xff] }
 0x13a   : > { %v1867_v63 = vpop.f32.mrb[10].mxu0 }
 0x13b   : > { %v560_v1 = vpop.f32.mrb[11].mxu0  ;;  %v2733_v2 = vsel %vm674_vm2, %v1867_v63, -1e+30 }
 0x13c   : > { %711 = vmax.xlane.f32.xlu0 %v2728_v0  ;;  %725 = vmax.xlane.f32.xlu1 %v2725_v62  ;;  %v2741_v6 = vsel %vm674_vm2, %v560_v1, -1e+30 }
 0x13e   : > { %v1870_v3 = vpop.f32.mrb[12].mxu0 }
 0x13f   : > { %v570_v5 = vpop.f32.mrb[13].mxu0  ;;  %v2749_v11 = vsel %vm674_vm2, %v1870_v3, -1e+30 }
 0x140   : > { %713 = vmax.xlane.f32.xlu0 %v2736_v4  ;;  %731 = vmax.xlane.f32.xlu1 %v2733_v2  ;;  %v2757_v13 = vsel %vm674_vm2, %v570_v5, -1e+30 }
 0x142   : > { %v1873_v7 = vpop.f32.mrb[14].mxu0 }
 0x143   : > { %v580_v9 = vpop.f32.mrb[15].mxu0  ;;  %v2765_v15 = vsel %vm674_vm2, %v1873_v7, -1e+30 }
 0x144   : > { %715 = vmax.xlane.f32.xlu0 %v2744_v8  ;;  %729 = vmax.xlane.f32.xlu1 %v2741_v6  ;;  %v2769_v16 = vsel %vm674_vm2, %v580_v9, -1e+30  ;;  %v696_v9 = vld [vmem:[#allocation2 + $0x18] sm:$0xff] }
 0x146   : > { %v1876_v17 = vpop.f32.mrb[16].mxu0 }
 0x147   : > { %v590_v18 = vpop.f32.mrb[17].mxu0 }
 0x148   : > { %717 = vmax.xlane.f32.xlu0 %v2752_v12  ;;  %735 = vmax.xlane.f32.xlu1 %v2749_v11  ;;  %v2000_v19 = vpack.c.bf16 %v1876_v17, %v590_v18 }
 0x14a   : > { %2064 = vmatprep.subr.bf16.mxu1 %v2000_v19  ;;  %2001 = vmatprep.subr.bf16.mxu0 %v2000_v19  ;;  %v1879_v20 = vpop.f32.mrb[18].mxu0 }
 0x14b   : > { %2072 = vmatpush3.bf16.xpose.msra.mxu1 %v2000_v19  ;;  %2003 = vmatpush3.bf16.xpose.msra.mxu0 %v2000_v19  ;;  %v600_v21 = vpop.f32.mrb[19].mxu0 }
 0x14c   : > { %719 = vmax.xlane.f32.xlu0 %v2760_v14  ;;  %733 = vmax.xlane.f32.xlu1 %v2757_v13  ;;  %v2004_v22 = vpack.c.bf16 %v1879_v20, %v600_v21 }
 0x14e   : > { %2065 = vmatprep.subr.bf16.mxu1 %v2004_v22  ;;  %2005 = vmatprep.subr.bf16.mxu0 %v2004_v22  ;;  %v1882_v23 = vpop.f32.mrb[20].mxu0 }
 0x14f   : > { %v610_v24 = vpop.f32.mrb[21].mxu0 }
 0x150   : > { %739 = vmax.xlane.f32.xlu1 %v2765_v15  ;;  %v2008_v25 = vpack.c.bf16 %v1882_v23, %v610_v24  ;;  %v697_v23 = vld [vmem:[#allocation2 + $0x20] sm:$0xff]  ;;  %v2830_v24 = vld [vmem:[#allocation2 + $0x68] sm:$0xff] }
 0x152   : > { %v1885_v26 = vpop.f32.mrb[22].mxu0 }
 0x153   : > { %2073 = vmatpush3.bf16.xpose.msra.mxu1 %v2004_v22  ;;  %2007 = vmatpush3.bf16.xpose.msra.mxu0 %v2004_v22  ;;  %v620_v27 = vpop.f32.mrb[23].mxu0 }
 0x154   : > { %737 = vmax.xlane.f32.xlu1 %v2769_v16  ;;  %2066 = vmatprep.subr.bf16.mxu1 %v2008_v25  ;;  %v2012_v28 = vpack.c.bf16 %v1885_v26, %v620_v27 }
 0x155   : > { %2009 = vmatprep.subr.bf16.mxu0 %v2008_v25 }
 0x156   : > { %v1888_v29 = vpop.f32.mrb[24].mxu0 }
 0x157   : > { %v630_v30 = vpop.f32.mrb[25].mxu0 }
 0x158   : > { %v2016_v31 = vpack.c.bf16 %v1888_v29, %v630_v30  ;;  %v698_v29 = vld [vmem:[#allocation2 + $0x28] sm:$0xff]  ;;  %v2839_v30 = vld [vmem:[#allocation2 + $0x60] sm:$0xff] }
 0x15a   : > { %v1891_v32 = vpop.f32.mrb[26].mxu0 }
 0x15b   : > { %2074 = vmatpush3.bf16.xpose.msra.mxu1 %v2008_v25  ;;  %2011 = vmatpush3.bf16.xpose.msra.mxu0 %v2008_v25  ;;  %v640_v33 = vpop.f32.mrb[27].mxu0 }
 0x15c   : > { %2067 = vmatprep.subr.bf16.mxu1 %v2012_v28  ;;  %2013 = vmatprep.subr.bf16.mxu0 %v2012_v28  ;;  %v2020_v34 = vpack.c.bf16 %v1891_v32, %v640_v33 }
 0x15e   : > { %v1894_v47 = vpop.f32.mrb[28].mxu0 }
 0x15f   : > { %v650_v51 = vpop.f32.mrb[29].mxu0 }
 0x160   : > { %v2024_v52 = vpack.c.bf16 %v1894_v47, %v650_v51  ;;  %v2862_v51 = vld [vmem:[#allocation2 + $0x70] sm:$0xff] }
 0x162   : > { %v1897_v7 = vpop.f32.mrb[30].mxu0 }
 0x163   : > { %2075 = vmatpush3.bf16.xpose.msra.mxu1 %v2012_v28  ;;  %2015 = vmatpush3.bf16.xpose.msra.mxu0 %v2012_v28  ;;  %v660_v17 = vpop.f32.mrb[31].mxu0 }
 0x164   : > { %2068 = vmatprep.subr.bf16.mxu1 %v2016_v31  ;;  %2017 = vmatprep.subr.bf16.mxu0 %v2016_v31  ;;  %v2028_v18 = vpack.c.bf16 %v1897_v7, %v660_v17 }
 0x16b   : > { %2076 = vmatpush3.bf16.xpose.msra.mxu1 %v2016_v31  ;;  %2019 = vmatpush3.bf16.xpose.msra.mxu0 %v2016_v31 }
 0x16c   : > { %2069 = vmatprep.subr.bf16.mxu1 %v2020_v34  ;;  %2021 = vmatprep.subr.bf16.mxu0 %v2020_v34 }
 0x173   : > { %2077 = vmatpush3.bf16.xpose.msra.mxu1 %v2020_v34  ;;  %2023 = vmatpush3.bf16.xpose.msra.mxu0 %v2020_v34 }
 0x174   : > { %2070 = vmatprep.subr.bf16.mxu1 %v2024_v52  ;;  %2025 = vmatprep.subr.bf16.mxu0 %v2024_v52 }
 0x17b   : > { %2078 = vmatpush3.bf16.xpose.msra.mxu1 %v2024_v52  ;;  %2027 = vmatpush3.bf16.xpose.msra.mxu0 %v2024_v52 }
 0x17c   : > { %2071 = vmatprep.subr.bf16.mxu1 %v2028_v18  ;;  %2029 = vmatprep.subr.bf16.mxu0 %v2028_v18 }
 0x183   : > { %2079 = vmatpush3.bf16.xpose.msra.mxu1 %v2028_v18  ;;  %2031 = vmatpush3.bf16.xpose.msra.mxu0 %v2028_v18 }
 0x1b6   : > { %v710_v36 = vpop.xlane.xlu0 %709 }
 0x1b7   : > { %v2775_v37 = vmax.f32 %v2772_v35, %v710_v36 }
 0x1b9   : > { %1319 = vst.msk [vmem:[#allocation2] sm:$0xff] %vm1013_vm3, %v2775_v37  ;;  %v757_v31 = vsub.f32 %v2772_v35, %v2775_v37 }
 0x1bb   : > { %v773_v35 = vmul.f32 1.442695, %v757_v31 }
 0x1bd   : > { %2191 = vpow2.f32 %v773_v35 }
 0x1c1   : > { %v724_v39 = vpop.xlane.xlu0 %723 }
 0x1c2   : > { %v2782_v40 = vmax.f32 %v2779_v38, %v724_v39  ;;  %v2851_v39 = vld [vmem:[#allocation2 + $0x78] sm:$0xff] }
 0x1c4   : > { %1326 = vst.msk [vmem:[#allocation2 + $0x38] sm:$0xff] %vm1013_vm3, %v2782_v40  ;;  %842 = vperm.xlu1 %2190, %v2782_v40   ;;  %v764_v7 = vsub.f32 %v2779_v38, %v2782_v40 }
 0x1c5   : > { %v722_v43 = vpop.xlane.xlu0 %721  ;;  %v728_v44 = vpop.xlane.xlu1 %727 }
 0x1c6   : > { %v2792_v45 = vmax.f32 %v2784_v41, %v722_v43  ;;  %v2795_v46 = vmax.f32 %v2786_v42, %v728_v44  ;;  %v787_v18 = vmul.f32 1.442695, %v764_v7 }
 0x1c8   : > { %1325 = vst.msk [vmem:[#allocation2 + $0x30] sm:$0xff] %vm1013_vm3, %v2792_v45  ;;  %1328 = vst.msk [vmem:[#allocation2 + $0x48] sm:$0xff] %vm1013_vm3, %v2795_v46  ;;  %837 = vperm.xlu0 %2189, %v2792_v45   ;;  %807 = vperm.xlu1 %2190, %v2775_v37   ;;  %v766_v38 = vsub.f32 %v2786_v42, %v2795_v46 }
 0x1c9   : > { %v712_v53 = vpop.xlane.xlu0 %711  ;;  %v726_v54 = vpop.xlane.xlu1 %725 }
 0x1ca   : > { %v742_v55 = vmax.f32 %v2797_v48, %v712_v53  ;;  %v2809_v56 = vmax.f32 %v2799_v49, %v726_v54 }
 0x1cc   : > { %1320 = vst.msk [vmem:[#allocation2 + $0x8] sm:$0xff] %vm1013_vm3, %v742_v55  ;;  %1327 = vst.msk [vmem:[#allocation2 + $0x40] sm:$0xff] %vm1013_vm3, %v2809_v56  ;;  %812 = vperm.xlu1 %2190, %v742_v55   ;;  %v758_v43 = vsub.f32 %v2797_v48, %v742_v55 }
 0x1cd   : > { %v714_v63 = vpop.xlane.xlu0 %713  ;;  %v732_v1 = vpop.xlane.xlu1 %731 }
 0x1ce   : > { %v743_v3 = vmax.f32 %v2811_v58, %v714_v63  ;;  %v2820_v5 = vmax.f32 %v2813_v61, %v732_v1  ;;  %v775_v52 = vmul.f32 1.442695, %v758_v43 }
 0x1d0   : > { %1321 = vst.msk [vmem:[#allocation2 + $0x10] sm:$0xff] %vm1013_vm3, %v743_v3  ;;  %1330 = vst.msk [vmem:[#allocation2 + $0x58] sm:$0xff] %vm1013_vm3, %v2820_v5  ;;  %817 = vperm.xlu1 %2190, %v743_v3   ;;  %v759_v48 = vsub.f32 %v2811_v58, %v743_v3  ;;  %2193 = vpow2.f32 %v775_v52 }
 0x1d1   : > { %v716_v19 = vpop.xlane.xlu0 %715  ;;  %v730_v20 = vpop.xlane.xlu1 %729 }
 0x1d2   : > { %v744_v21 = vmax.f32 %v696_v9, %v716_v19  ;;  %v2828_v22 = vmax.f32 %v2822_v10, %v730_v20  ;;  %v777_v58 = vmul.f32 1.442695, %v759_v48  ;;  %v763_v19 = vsub.f32 %v2784_v41, %v2792_v45  ;;  %v2885_v20 = vpop.eup %2191 }
 0x1d3   : > { %v791_v41 = vmul.f32 1.442695, %v766_v38  ;;  %v768_v45 = vsub.f32 %v2813_v61, %v2820_v5 }
 0x1d4   : > { %1322 = vst.msk [vmem:[#allocation2 + $0x18] sm:$0xff] %vm1013_vm3, %v744_v21  ;;  %1329 = vst.msk [vmem:[#allocation2 + $0x50] sm:$0xff] %vm1013_vm3, %v2828_v22  ;;  %852 = vperm.xlu1 %2190, %v2795_v46   ;;  %v760_v37 = vsub.f32 %v696_v9, %v744_v21 }
 0x1d5   : > { %v718_v25 = vpop.xlane.xlu0 %717  ;;  %v736_v26 = vpop.xlane.xlu1 %735 }
 0x1d6   : > { %v745_v27 = vmax.f32 %v697_v23, %v718_v25  ;;  %v2837_v28 = vmax.f32 %v2830_v24, %v736_v26  ;;  %v779_v54 = vmul.f32 1.442695, %v760_v37  ;;  %v767_v26 = vsub.f32 %v2822_v10, %v2828_v22 }
 0x1d8   : > { %1323 = vst.msk [vmem:[#allocation2 + $0x20] sm:$0xff] %vm1013_vm3, %v745_v27  ;;  %1332 = vst.msk [vmem:[#allocation2 + $0x68] sm:$0xff] %vm1013_vm3, %v2837_v28  ;;  %872 = vperm.xlu0 %2189, %v2837_v28   ;;  %847 = vperm.xlu1 %2190, %v2809_v56   ;;  %2195 = vpow2.f32 %v779_v54  ;;  %v761_v9 = vsub.f32 %v697_v23, %v745_v27  ;;  %v765_v23 = vsub.f32 %v2799_v49, %v2809_v56 }
 0x1d9   : > { %v720_v32 = vpop.xlane.xlu0 %719  ;;  %v734_v33 = vpop.xlane.xlu1 %733  ;;  %2197 = vpow2.f32 %v777_v58  ;;  %v795_v49 = vmul.f32 1.442695, %v768_v45  ;;  %v770_v56 = vsub.f32 %v2830_v24, %v2837_v28 }
 0x1da   : > { %v746_v34 = vmax.f32 %v698_v29, %v720_v32  ;;  %v2849_v36 = vmax.f32 %v2839_v30, %v734_v33  ;;  %v781_v40 = vmul.f32 1.442695, %v761_v9  ;;  %v2892_v25 = vpop.eup %2193  ;;  %v789_v46 = vmul.f32 1.442695, %v765_v23 }
 0x1db   : > { %v799_v10 = vmul.f32 1.442695, %v770_v56 }
 0x1dc   : > { %1324 = vst.msk [vmem:[#allocation2 + $0x28] sm:$0xff] %vm1013_vm3, %v746_v34  ;;  %1331 = vst.msk [vmem:[#allocation2 + $0x60] sm:$0xff] %vm1013_vm3, %v2849_v36  ;;  %867 = vperm.xlu0 %2189, %v2849_v36   ;;  %862 = vperm.xlu1 %2190, %v2820_v5   ;;  %v762_v55 = vsub.f32 %v698_v29, %v746_v34 }
 0x1dd   : > { %v740_v44 = vpop.xlane.xlu1 %739 }
 0x1de   : > { %v2860_v47 = vmax.f32 %v2851_v39, %v740_v44  ;;  %v783_v17 = vmul.f32 1.442695, %v762_v55 }
 0x1e0   : > { %v772_v53 = vsub.f32 %v2851_v39, %v2860_v47  ;;  %1334 = vst.msk [vmem:[#allocation2 + $0x78] sm:$0xff] %vm1013_vm3, %v2860_v47  ;;  %857 = vperm.xlu1 %2190, %v2828_v22   ;;  %2199 = vpow2.f32 %v783_v17  ;;  %v769_v22 = vsub.f32 %v2839_v30, %v2849_v36 }
 0x1e1   : > { %v738_v63 = vpop.xlane.xlu1 %737  ;;  %2201 = vpow2.f32 %v787_v18 }
 0x1e2   : > { %v2871_v1 = vmax.f32 %v2862_v51, %v738_v63  ;;  %2203 = vpow2.f32 %v781_v40  ;;  %v2894_v42 = vpop.eup %2195  ;;  %v797_v24 = vmul.f32 1.442695, %v769_v22 }
 0x1e3   : > { %v2902_v61 = vpop.eup %2197 }
 0x1e4   : > { %v771_v3 = vsub.f32 %v2862_v51, %v2871_v1  ;;  %1333 = vst.msk [vmem:[#allocation2 + $0x70] sm:$0xff] %vm1013_vm3, %v2871_v1  ;;  %822 = vperm.xlu1 %2190, %v744_v21   ;;  %877 = vperm.xlu0 %2189, %v2871_v1   ;;  %v785_v21 = vmul.f32 1.442695, %v763_v19 }
 0x1e6   : > { %2205 = vpow2.f32 %v785_v21 }
 0x1e7   : > { %2207 = vpow2.f32 %v791_v41 }
 0x1e8   : > { %827 = vperm.xlu1 %2190, %v745_v27   ;;  %882 = vperm.xlu0 %2189, %v2860_v47   ;;  %2209 = vpow2.f32 %v789_v46  ;;  %v793_v27 = vmul.f32 1.442695, %v767_v26 }
 0x1e9   : > { %2211 = vpow2.f32 %v795_v49 }
 0x1ea   : > { %v2904_v5 = vpop.eup %2199  ;;  %2213 = vpow2.f32 %v793_v27 }
 0x1eb   : > { %v2910_v29 = vpop.eup %2201  ;;  %2215 = vpow2.f32 %v799_v10 }
 0x1ec   : > { %832 = vperm.xlu1 %2190, %v746_v34   ;;  %1193 = vperm.xlu0 %2189, %v2885_v20   ;;  %v2912_v31 = vpop.eup %2203  ;;  %2217 = vpow2.f32 %v797_v24 }
 0x1f0   : > { %1198 = vperm.xlu1 %2190, %v2892_v25   ;;  %1208 = vperm.xlu0 %2189, %v2894_v42   ;;  %v2916_v28 = vpop.eup %2205 }
 0x1f1   : > { %v2918_v32 = vpop.eup %2207 }
 0x1f2   : > { %v2922_v30 = vpop.eup %2209 }
 0x1f3   : > { %v2924_v33 = vpop.eup %2211 }
 0x1f4   : > { %1203 = vperm.xlu1 %2190, %v2902_v61   ;;  %1218 = vperm.xlu0 %2189, %v2904_v5   ;;  %v2928_v34 = vpop.eup %2213 }
 0x1f5   : > { %v2930_v36 = vpop.eup %2215 }
 0x1f6   : > { %v2934_v43 = vpop.eup %2217 }
 0x1f8   : > { %1213 = vperm.xlu1 %2190, %v2912_v31   ;;  %1228 = vperm.xlu0 %2189, %v2910_v29  }
 0x1fc   : > { %1223 = vperm.xlu1 %2190, %v2916_v28   ;;  %1238 = vperm.xlu0 %2189, %v2918_v32  }
 0x200   : > { %1233 = vperm.xlu1 %2190, %v2922_v30   ;;  %1248 = vperm.xlu0 %2189, %v2924_v33  }
 0x204   : > { %1243 = vperm.xlu1 %2190, %v2928_v34   ;;  %1258 = vperm.xlu0 %2189, %v2930_v36  }
 0x208   : > { %1253 = vperm.xlu1 %2190, %v2934_v43  }
 0x243   : > { %v843_v35 = vpop.permute.xlu1 %842 }
 0x244   : > { %v892_v37 = vsub.f32 %v2713_v57, %v843_v35 }
 0x246   : > { %v915_v55 = vmul.f32 1.442695, %v892_v37 }
 0x247   : > { %v838_v44 = vpop.permute.xlu0 %837  ;;  %v808_v52 = vpop.permute.xlu1 %807 }
 0x248   : > { %v891_v48 = vsub.f32 %v2717_v59, %v838_v44  ;;  %v885_v54 = vsub.f32 %v2709_v50, %v808_v52 }
 0x24a   : > { %v913_v63 = vmul.f32 1.442695, %v891_v48  ;;  %v901_v7 = vmul.f32 1.442695, %v885_v54 }
 0x24b   : > { %v813_v58 = vpop.permute.xlu1 %812 }
 0x24c   : > { %2219 = vpow2.f32 %v913_v63  ;;  %v886_v9 = vsub.f32 %v2728_v0, %v813_v58 }
 0x24d   : > { %2221 = vpow2.f32 %v901_v7 }
 0x24e   : > { %2223 = vpow2.f32 %v915_v55  ;;  %v903_v17 = vmul.f32 1.442695, %v886_v9 }
 0x24f   : > { %v818_v18 = vpop.permute.xlu1 %817 }
 0x250   : > { %2225 = vpow2.f32 %v903_v17  ;;  %v887_v57 = vsub.f32 %v2736_v4, %v818_v18 }
 0x252   : > { %v905_v19 = vmul.f32 1.442695, %v887_v57 }
 0x253   : > { %v853_v38 = vpop.permute.xlu1 %852 }
 0x254   : > { %2227 = vpow2.f32 %v905_v19  ;;  %v894_v50 = vsub.f32 %v2720_v60, %v853_v38 }
 0x256   : > { %v2942_v59 = vpop.eup %2219  ;;  %v919_v45 = vmul.f32 1.442695, %v894_v50 }
 0x257   : > { %v2222_v40 = vpop.eup %2221  ;;  %1939 = vmatprep.mubr.f32.mxu1 %v2942_v59  ;;  %v873_v21 = vpop.permute.xlu0 %872 }
 0x258   : > { %v848_v23 = vpop.permute.xlu1 %847  ;;  %v2946_v0 = vpop.eup %2223  ;;  %965 = vadd.xlane.f32.xlu1 %v2222_v40  ;;  %1930 = vmatprep.mubr.f32.mxu0 %v2222_v40  ;;  %v898_v24 = vsub.f32 %v2749_v11, %v873_v21 }
 0x259   : > { %v893_v41 = vsub.f32 %v2725_v62, %v848_v23  ;;  %1940 = vmatmul.mubr.f32.vlgmr.msra.gmra.mrb[0].mxu1 %v2946_v0 }
 0x25a   : > { %v2226_v4 = vpop.eup %2225  ;;  %v927_v54 = vmul.f32 1.442695, %v898_v24  ;;  %v934_v24 = vld [vmem:[#allocation3 + $0x8] sm:$0xff] }
 0x25b   : > { %v917_v46 = vmul.f32 1.442695, %v893_v41  ;;  %v868_v26 = vpop.permute.xlu0 %867  ;;  %967 = vadd.xlane.f32.xlu0 %v2226_v4  ;;  %1931 = vmatmul.mubr.f32.vlgmr.msra.gmra.mrb[32].mxu0 %v2226_v4  ;;  %v801_v41 = vmul.f32 1.442695, %v771_v3  ;;  %v803_v4 = vmul.f32 1.442695, %v772_v53 }
 0x25c   : > { %v863_v49 = vpop.permute.xlu1 %862  ;;  %v897_v27 = vsub.f32 %v2757_v13, %v868_v26 }
 0x25d   : > { %2229 = vpow2.f32 %v917_v46  ;;  %v896_v60 = vsub.f32 %v2733_v2, %v863_v49 }
 0x25e   : > { %v2228_v56 = vpop.eup %2227  ;;  %2231 = vpow2.f32 %v919_v45  ;;  %v925_v35 = vmul.f32 1.442695, %v897_v27 }
 0x25f   : > { %969 = vadd.xlane.f32.xlu0 %v2228_v56  ;;  %1933 = vmatprep.mubr.f32.mxu0 %v2228_v56  ;;  %v923_v22 = vmul.f32 1.442695, %v896_v60 }
 0x260   : > { %v858_v10 = vpop.permute.xlu1 %857 }
 0x261   : > { %v895_v62 = vsub.f32 %v2741_v6, %v858_v10  ;;  %v933_v10 = vld [vmem:[#allocation3] sm:$0xff] }
 0x263   : > { %v921_v37 = vmul.f32 1.442695, %v895_v62  ;;  %v878_v44 = vpop.permute.xlu0 %877 }
 0x264   : > { %v823_v52 = vpop.permute.xlu1 %822  ;;  %v899_v48 = vsub.f32 %v2769_v16, %v878_v44  ;;  %v950_v44 = vmul.f32 %v2892_v25, %v934_v24  ;;  %v945_v24 = vld [vmem:[#allocation3 + $0x60] sm:$0xff] }
 0x265   : > { %2233 = vpow2.f32 %v921_v37  ;;  %v888_v2 = vsub.f32 %v2744_v8, %v823_v52 }
 0x266   : > { %2235 = vpow2.f32 %v923_v22  ;;  %v929_v63 = vmul.f32 1.442695, %v899_v48  ;;  %v949_v22 = vmul.f32 %v2885_v20, %v933_v10  ;;  %v935_v48 = vld [vmem:[#allocation3 + $0x10] sm:$0xff] }
 0x267   : > { %2237 = vpow2.f32 %v925_v35  ;;  %v907_v13 = vmul.f32 1.442695, %v888_v2  ;;  %v2230_v55 = vpop.eup %2229  ;;  %v883_v7 = vpop.permute.xlu0 %882 }
 0x268   : > { %v828_v6 = vpop.permute.xlu1 %827  ;;  %v2232_v58 = vpop.eup %2231  ;;  %v900_v11 = vsub.f32 %v2765_v15, %v883_v7  ;;  %1942 = vmatprep.mubr.f32.mxu1 %v2230_v55 }
 0x269   : > { %v889_v9 = vsub.f32 %v2752_v12, %v828_v6  ;;  %2239 = vpow2.f32 %v907_v13  ;;  %1943 = vmatmul.mubr.f32.gmra.mrb[2].mxu1 %v2232_v58  ;;  %v937_v6 = vld [vmem:[#allocation3 + $0x20] sm:$0xff] }
 0x26a   : > { %2241 = vpow2.f32 %v927_v54  ;;  %v931_v16 = vmul.f32 1.442695, %v900_v11  ;;  %v951_v54 = vmul.f32 %v2902_v61, %v935_v48  ;;  %v953_v25 = vmul.f32 %v2912_v31, %v937_v6  ;;  %v938_v11 = vld [vmem:[#allocation3 + $0x28] sm:$0xff] }
 0x26b   : > { %v909_v17 = vmul.f32 1.442695, %v889_v9  ;;  %2243 = vpow2.f32 %v929_v63  ;;  %v2975_v46 = vpop.permute.xlu0 %1193  ;;  %v936_v63 = vld [vmem:[#allocation3 + $0x18] sm:$0xff]  ;;  %v954_v61 = vmul.f32 %v2904_v5, %v938_v11  ;;  %v942_v5 = vld [vmem:[#allocation3 + $0x48] sm:$0xff] }
 0x26c   : > { %v833_v8 = vpop.permute.xlu1 %832  ;;  %2245 = vpow2.f32 %v931_v16  ;;  %v952_v20 = vmul.f32 %v2894_v42, %v936_v63  ;;  %v939_v16 = vld [vmem:[#allocation3 + $0x30] sm:$0xff]  ;;  %v1176_v11 = vld [vmem:[#allocation4 + $0x8] sm:$0xff] }
 0x26d   : > { %v890_v18 = vsub.f32 %v2760_v14, %v833_v8  ;;  %2247 = vpow2.f32 %v909_v17  ;;  %v955_v8 = vmul.f32 %v2916_v28, %v939_v16 }
 0x26f   : > { %v2234_v57 = vpop.eup %2233  ;;  %v911_v19 = vmul.f32 1.442695, %v890_v18  ;;  %v2979_v1 = vpop.permute.xlu0 %1208 }
 0x270   : > { %v2236_v38 = vpop.eup %2235  ;;  %1945 = vmatprep.mubr.f32.mxu1 %v2234_v57  ;;  %v2973_v45 = vpop.permute.xlu1 %1198 }
 0x271   : > { %v2238_v50 = vpop.eup %2237  ;;  %2249 = vpow2.f32 %v911_v19  ;;  %1946 = vmatmul.mubr.f32.gmra.mrb[4].mxu1 %v2236_v38 }
 0x272   : > { %1948 = vmatprep.mubr.f32.mxu1 %v2238_v50  ;;  %2251 = vpow2.f32 %v801_v41 }
 0x273   : > { %v2240_v12 = vpop.eup %2239  ;;  %2253 = vpow2.f32 %v803_v4  ;;  %v2983_v47 = vpop.permute.xlu0 %1218 }
 0x274   : > { %v2242_v15 = vpop.eup %2241  ;;  %971 = vadd.xlane.f32.xlu1 %v2240_v12  ;;  %1934 = vmatmul.mubr.f32.gmra.mrb[34].mxu0 %v2240_v12  ;;  %v2977_v51 = vpop.permute.xlu1 %1203 }
 0x275   : > { %v2244_v40 = vpop.eup %2243  ;;  %1949 = vmatmul.mubr.f32.gmra.mrb[6].mxu1 %v2242_v15 }
 0x276   : > { %v2246_v21 = vpop.eup %2245  ;;  %1951 = vmatprep.mubr.f32.mxu1 %v2244_v40 }
 0x277   : > { %v2248_v23 = vpop.eup %2247  ;;  %v2987_v3 = vpop.permute.xlu0 %1228 }
 0x278   : > { %973 = vadd.xlane.f32.xlu0 %v2248_v23  ;;  %1936 = vmatprep.mubr.f32.mxu0 %v2248_v23  ;;  %v2981_v39 = vpop.permute.xlu1 %1213  ;;  %v943_v23 = vld [vmem:[#allocation3 + $0x50] sm:$0xff] }
 0x279   : > { %1952 = vmatmul.mubr.f32.gmra.mrb[8].mxu1 %v2246_v21  ;;  %v959_v41 = vmul.f32 %v2928_v34, %v943_v23 }
 0x27b   : > { %v2250_v14 = vpop.eup %2249  ;;  %v2991_v49 = vpop.permute.xlu0 %1238 }
 0x27c   : > { %975 = vadd.xlane.f32.xlu1 %v2250_v14  ;;  %1937 = vmatmul.mubr.f32.gmra.mrb[36].mxu0 %v2250_v14  ;;  %v2985_v53 = vpop.permute.xlu1 %1223  ;;  %v958_v14 = vmul.f32 %v2918_v32, %v942_v5  ;;  %v946_v32 = vld [vmem:[#allocation3 + $0x68] sm:$0xff] }
 0x27d   : > { %977 = vadd.xlane.f32.xlu0 %v2942_v59  ;;  %v2967_v59 = vpop.eup %2251 }
 0x27f   : > { %v2995_v56 = vpop.permute.xlu0 %1248 }
 0x280   : > { %979 = vadd.xlane.f32.xlu1 %v2946_v0  ;;  %v2970_v0 = vpop.eup %2253  ;;  %v2989_v26 = vpop.permute.xlu1 %1233 }
 0x281   : > { %981 = vadd.xlane.f32.xlu0 %v2230_v55 }
 0x283   : > { %v2999_v62 = vpop.permute.xlu0 %1258 }
 0x284   : > { %983 = vadd.xlane.f32.xlu1 %v2232_v58  ;;  %v2993_v60 = vpop.permute.xlu1 %1243 }
 0x285   : > { %985 = vadd.xlane.f32.xlu0 %v2234_v57  ;;  %v940_v57 = vld [vmem:[#allocation3 + $0x38] sm:$0xff] }
 0x286   : > { %v956_v31 = vmul.f32 %v2910_v29, %v940_v57  ;;  %v944_v29 = vld [vmem:[#allocation3 + $0x58] sm:$0xff] }
 0x288   : > { %987 = vadd.xlane.f32.xlu1 %v2236_v38  ;;  %v2997_v27 = vpop.permute.xlu1 %1253  ;;  %v941_v38 = vld [vmem:[#allocation3 + $0x40] sm:$0xff] }
 0x289   : > { %989 = vadd.xlane.f32.xlu0 %v2238_v50  ;;  %v957_v12 = vmul.f32 %v2922_v30, %v941_v38 }
 0x28c   : > { %991 = vadd.xlane.f32.xlu1 %v2242_v15 }
 0x28d   : > { %993 = vadd.xlane.f32.xlu0 %v2244_v40 }
 0x290   : > { %995 = vadd.xlane.f32.xlu1 %v2246_v21 }
 0x2a1   : > { %1263 = vperm.xlu1 %2190, %v2967_v59  }
 0x2a3   : > { %1268 = vperm.xlu0 %2189, %v2970_v0  }
 0x2e5   : > { %v966_v35 = vpop.xlane.xlu1 %965 }
 0x2e6   : > { %v997_v37 = vadd.f32 %v966_v35, %v949_v22  ;;  %v960_v35 = vmul.f32 %v2924_v33, %v944_v29  ;;  %v948_v33 = vld [vmem:[#allocation3 + $0x78] sm:$0xff]  ;;  %v1188_v29 = vld [vmem:[#allocation4 + $0x68] sm:$0xff] }
 0x2e8   : > { %1014 = vst.msk [vmem:[#allocation3] sm:$0xff] %vm1013_vm3, %v997_v37  ;;  %v968_v52 = vpop.xlane.xlu0 %967  ;;  %v961_v37 = vmul.f32 %v2934_v43, %v945_v24  ;;  %v964_v43 = vmul.f32 %v2970_v0, %v948_v33 }
 0x2e9   : > { %v998_v2 = vadd.f32 %v968_v52, %v950_v44 }
 0x2eb   : > { %1015 = vst.msk [vmem:[#allocation3 + $0x8] sm:$0xff] %vm1013_vm3, %v998_v2  ;;  %v947_v2 = vld [vmem:[#allocation3 + $0x70] sm:$0xff] }
 0x2ec   : > { %v970_v13 = vpop.xlane.xlu0 %969 }
 0x2ed   : > { %v999_v55 = vadd.f32 %v970_v13, %v951_v54  ;;  %v962_v54 = vmul.f32 %v2930_v36, %v946_v32  ;;  %v963_v13 = vmul.f32 %v2967_v59, %v947_v2  ;;  %v1182_v36 = vld [vmem:[#allocation4 + $0x38] sm:$0xff]  ;;  %v1189_v2 = vld [vmem:[#allocation4 + $0x70] sm:$0xff] }
 0x2ee   : > { %v1278_v59 = vmul.f32 %v2987_v3, %v1182_v36  ;;  %v1183_v3 = vld [vmem:[#allocation4 + $0x40] sm:$0xff] }
 0x2ef   : > { %1016 = vst.msk [vmem:[#allocation3 + $0x10] sm:$0xff] %vm1013_vm3, %v999_v55 }
 0x301   : > { %v972_v7 = vpop.xlane.xlu1 %971 }
 0x302   : > { %v1000_v58 = vadd.f32 %v972_v7, %v952_v20 }
 0x304   : > { %1017 = vst.msk [vmem:[#allocation3 + $0x18] sm:$0xff] %vm1013_vm3, %v1000_v58 }
 0x305   : > { %v974_v9 = vpop.xlane.xlu0 %973 }
 0x306   : > { %v1001_v17 = vadd.f32 %v974_v9, %v953_v25  ;;  %v1181_v25 = vld [vmem:[#allocation4 + $0x30] sm:$0xff]  ;;  %v1175_v9 = vld [vmem:[#allocation4] sm:$0xff] }
 0x307   : > { %v1277_v16 = vmul.f32 %v2985_v53, %v1181_v25  ;;  %v1271_v0 = vmul.f32 %v2975_v46, %v1175_v9  ;;  %v1186_v46 = vld [vmem:[#allocation4 + $0x58] sm:$0xff] }
 0x308   : > { %1018 = vst.msk [vmem:[#allocation3 + $0x20] sm:$0xff] %vm1013_vm3, %v1001_v17  ;;  %v1282_v23 = vmul.f32 %v2995_v56, %v1186_v46 }
 0x309   : > { %v976_v18 = vpop.xlane.xlu1 %975 }
 0x30a   : > { %v978_v42 = vpop.xlane.xlu0 %977  ;;  %v1002_v19 = vadd.f32 %v976_v18, %v954_v61  ;;  %v1272_v61 = vmul.f32 %v2973_v45, %v1176_v11 }
 0x30b   : > { %v1003_v50 = vadd.f32 %v978_v42, %v955_v8 }
 0x30c   : > { %1019 = vst.msk [vmem:[#allocation3 + $0x28] sm:$0xff] %vm1013_vm3, %v1002_v19 }
 0x30d   : > { %1020 = vst.msk [vmem:[#allocation3 + $0x30] sm:$0xff] %vm1013_vm3, %v1003_v50  ;;  %v980_v15 = vpop.xlane.xlu1 %979 }
 0x30e   : > { %v982_v40 = vpop.xlane.xlu0 %981  ;;  %v1004_v21 = vadd.f32 %v980_v15, %v956_v31  ;;  %v1184_v31 = vld [vmem:[#allocation4 + $0x48] sm:$0xff] }
 0x30f   : > { %v1005_v28 = vadd.f32 %v982_v40, %v957_v12  ;;  %v1280_v53 = vmul.f32 %v2991_v49, %v1184_v31  ;;  %v1279_v12 = vmul.f32 %v2989_v26, %v1183_v3 }
 0x310   : > { %1021 = vst.msk [vmem:[#allocation3 + $0x38] sm:$0xff] %vm1013_vm3, %v1004_v21  ;;  %v1185_v21 = vld [vmem:[#allocation4 + $0x50] sm:$0xff] }
 0x311   : > { %1022 = vst.msk [vmem:[#allocation3 + $0x40] sm:$0xff] %vm1013_vm3, %v1005_v28  ;;  %v984_v4 = vpop.xlane.xlu1 %983  ;;  %v1178_v28 = vld [vmem:[#allocation4 + $0x18] sm:$0xff] }
 0x312   : > { %v986_v10 = vpop.xlane.xlu0 %985  ;;  %v1006_v22 = vadd.f32 %v984_v4, %v958_v14  ;;  %v1281_v14 = vmul.f32 %v2993_v60, %v1185_v21  ;;  %v1177_v4 = vld [vmem:[#allocation4 + $0x10] sm:$0xff]  ;;  %v1274_v24 = vmul.f32 %v2979_v1, %v1178_v28  ;;  %v1190_v60 = vld [vmem:[#allocation4 + $0x78] sm:$0xff]  ;;  %v1180_v1 = vld [vmem:[#allocation4 + $0x28] sm:$0xff] }
 0x313   : > { %v1007_v30 = vadd.f32 %v986_v10, %v959_v41 }
 0x314   : > { %1023 = vst.msk [vmem:[#allocation3 + $0x48] sm:$0xff] %vm1013_vm3, %v1006_v22  ;;  %v1187_v22 = vld [vmem:[#allocation4 + $0x60] sm:$0xff] }
 0x315   : > { %1024 = vst.msk [vmem:[#allocation3 + $0x50] sm:$0xff] %vm1013_vm3, %v1007_v30  ;;  %v988_v44 = vpop.xlane.xlu1 %987  ;;  %v1273_v30 = vmul.f32 %v2977_v51, %v1177_v4  ;;  %v1179_v51 = vld [vmem:[#allocation4 + $0x20] sm:$0xff] }
 0x316   : > { %v990_v52 = vpop.xlane.xlu0 %989  ;;  %v1008_v48 = vadd.f32 %v988_v44, %v960_v35  ;;  %v1284_v35 = vmul.f32 %v2999_v62, %v1188_v29  ;;  %v1283_v44 = vmul.f32 %v2997_v27, %v1187_v22  ;;  %v1276_v27 = vmul.f32 %v2983_v47, %v1180_v1 }
 0x317   : > { %v1009_v34 = vadd.f32 %v990_v52, %v961_v37  ;;  %v2404_v47 = vmov (!%p1747_p4), 0  }
 0x318   : > { %1025 = vst.msk [vmem:[#allocation3 + $0x58] sm:$0xff] %vm1013_vm3, %v1008_v48  ;;  %2256 = vset.pattern.permute.xlu1 (!%p1747_p4), %v2404_v47  ;;  %2255 = vset.pattern.permute.xlu0 (!%p1747_p4), %v2404_v47 }
 0x319   : > { %1026 = vst.msk [vmem:[#allocation3 + $0x60] sm:$0xff] %vm1013_vm3, %v1009_v34  ;;  %v992_v55 = vpop.xlane.xlu1 %991 }
 0x31a   : > { %v994_v63 = vpop.xlane.xlu0 %993  ;;  %v1010_v20 = vadd.f32 %v992_v55, %v962_v54 }
 0x31b   : > { %v1011_v7 = vadd.f32 %v994_v63, %v963_v13 }
 0x31c   : > { %1027 = vst.msk [vmem:[#allocation3 + $0x68] sm:$0xff] %vm1013_vm3, %v1010_v20 }
 0x31d   : > { %1028 = vst.msk [vmem:[#allocation3 + $0x70] sm:$0xff] %vm1013_vm3, %v1011_v7  ;;  %v996_v6 = vpop.xlane.xlu1 %995 }
 0x31e   : > { %v1012_v58 = vadd.f32 %v996_v6, %v964_v43  ;;  %v1275_v6 = vmul.f32 %v2981_v39, %v1179_v51  ;;  %v1356_v39 = vld [vmem:[#allocation3 + $0x8] sm:$0xff] (!%p1747_p4) }
 0x31f   : > { %v1366_v3 = vld [vmem:[#allocation3 + $0x58] sm:$0xff] (!%p1747_p4) }
 0x320   : > { %1029 = vst.msk [vmem:[#allocation3 + $0x78] sm:$0xff] %vm1013_vm3, %v1012_v58 }
 0x321   : > { %v1264_v34 = vpop.permute.xlu1 %1263 }
 0x322   : > { %v1269_v37 = vpop.permute.xlu0 %1268  ;;  %v1285_v62 = vmul.f32 %v1264_v34, %v1189_v2  ;;  %v1486_v2 = vld [vmem:[%s3184_s3 + $0x18] sm:$0xff] (!%p1747_p4) }
 0x323   : > { %v1286_v63 = vmul.f32 %v1269_v37, %v1190_v60 }
 0x324   : > { %v1369_v28 = vld [vmem:[#allocation3 + $0x70] sm:$0xff] (!%p1747_p4) }
 0x327   : > { %v1370_v21 = vld [vmem:[#allocation3 + $0x78] sm:$0xff] (!%p1747_p4) }
 0x32c   : > { %v1941_v17 = vpop.f32.mrb[0].mxu1 }
 0x32d   : > { %v1294_v8 = vadd.f32 %v1941_v17, %v1278_v59  ;;  %v1126_v18 = vpop.f32.mrb[1].mxu1  ;;  %v1357_v59 = vld [vmem:[#allocation3 + $0x10] sm:$0xff] (!%p1747_p4)  ;;  %v1358_v17 = vld [vmem:[#allocation3 + $0x18] sm:$0xff] (!%p1747_p4) }
 0x32e   : > { %v1293_v57 = vadd.f32 %v1277_v16, %v1126_v18  ;;  %v1932_v42 = vpop.f32.mrb[32].mxu0  ;;  %v1355_v16 = vld [vmem:[#allocation3] sm:$0xff] (!%p1747_p4)  ;;  %2257 = vrcp.f32 (!%p1747_p4), %v1357_v59  ;;  %v1362_v18 = vld [vmem:[#allocation3 + $0x38] sm:$0xff] (!%p1747_p4) }
 0x32f   : > { %1310 = vst [vmem:[#allocation4 + $0x38] sm:$0xff] %v1294_v8  ;;  %v1288_v19 = vadd.f32 %v1932_v42, %v1272_v61  ;;  %v1096_v38 = vpop.f32.mrb[33].mxu0  ;;  %2259 = vrcp.f32 (!%p1747_p4), %v1355_v16  ;;  %v1360_v61 = vld [vmem:[#allocation3 + $0x28] sm:$0xff] (!%p1747_p4)  ;;  %v1359_v8 = vld [vmem:[#allocation3 + $0x20] sm:$0xff] (!%p1747_p4) }
 0x330   : > { %1309 = vst [vmem:[#allocation4 + $0x30] sm:$0xff] %v1293_v57  ;;  %v1287_v50 = vadd.f32 %v1271_v0, %v1096_v38  ;;  %2261 = vrcp.f32 (!%p1747_p4), %v1358_v17  ;;  %v1361_v0 = vld [vmem:[#allocation3 + $0x30] sm:$0xff] (!%p1747_p4)  ;;  %v1487_v59 = vld [vmem:[%s3184_s3 + $0x20] sm:$0xff] (!%p1747_p4) }
 0x331   : > { %1304 = vst [vmem:[#allocation4 + $0x8] sm:$0xff] %v1288_v19  ;;  %2263 = vrcp.f32 (!%p1747_p4), %v1356_v39  ;;  %v1364_v19 = vld [vmem:[#allocation3 + $0x48] sm:$0xff] (!%p1747_p4) }
 0x332   : > { %1303 = vst [vmem:[#allocation4] sm:$0xff] %v1287_v50  ;;  %2265 = vrcp.f32 (!%p1747_p4), %v1360_v61  ;;  %v1363_v50 = vld [vmem:[#allocation3 + $0x40] sm:$0xff] (!%p1747_p4) }
 0x333   : > { %2267 = vrcp.f32 (!%p1747_p4), %v1359_v8 }
 0x334   : > { %2269 = vrcp.f32 (!%p1747_p4), %v1362_v18 }
 0x335   : > { %2271 = vrcp.f32 (!%p1747_p4), %v1361_v0 }
 0x336   : > { %2273 = vrcp.f32 (!%p1747_p4), %v1364_v19  ;;  %v1346_v39 = vld [vmem:[#allocation4 + $0x38] sm:$0xff] (!%p1747_p4)  ;;  %v1489_v19 = vld [vmem:[%s3184_s3 + $0x30] sm:$0xff] (!%p1747_p4) }
 0x337   : > { %2275 = vrcp.f32 (!%p1747_p4), %v1363_v50  ;;  %v1345_v8 = vld [vmem:[#allocation4 + $0x30] sm:$0xff] (!%p1747_p4) }
 0x338   : > { %v2258_v57 = vpop.eup (!%p1747_p4), %2257  ;;  %2277 = vrcp.f32 (!%p1747_p4), %v1366_v3 }
 0x339   : > { %v2260_v42 = vpop.eup (!%p1747_p4), %2259  ;;  %1399 = vperm.xlu1 (!%p1747_p4), %2256, %v2258_v57  }
 0x33a   : > { %v2262_v38 = vpop.eup (!%p1747_p4), %2261  ;;  %1389 = vperm.xlu0 (!%p1747_p4), %2255, %v2260_v42   ;;  %v1490_v42 = vld [vmem:[%s3184_s3 + $0x38] sm:$0xff] (!%p1747_p4) }
 0x33b   : > { %v2264_v31 = vpop.eup (!%p1747_p4), %2263 }
 0x33c   : > { %v1944_v45 = vpop.f32.mrb[2].mxu1 }
 0x33d   : > { %v1296_v15 = vadd.f32 %v1944_v45, %v1280_v53  ;;  %v1136_v5 = vpop.f32.mrb[3].mxu1  ;;  %1404 = vperm.xlu1 (!%p1747_p4), %2256, %v2262_v38   ;;  %v2266_v53 = vpop.eup (!%p1747_p4), %2265 }
 0x33e   : > { %v1295_v40 = vadd.f32 %v1279_v12, %v1136_v5  ;;  %1394 = vperm.xlu0 (!%p1747_p4), %2255, %v2264_v31   ;;  %v1365_v12 = vld [vmem:[#allocation3 + $0x50] sm:$0xff] (!%p1747_p4)  ;;  %v2268_v45 = vpop.eup (!%p1747_p4), %2267 }
 0x33f   : > { %1312 = vst [vmem:[#allocation4 + $0x48] sm:$0xff] %v1296_v15  ;;  %2279 = vrcp.f32 (!%p1747_p4), %v1365_v12  ;;  %v1368_v15 = vld [vmem:[#allocation3 + $0x68] sm:$0xff] (!%p1747_p4)  ;;  %v2270_v5 = vpop.eup (!%p1747_p4), %2269 }
 0x340   : > { %1311 = vst [vmem:[#allocation4 + $0x40] sm:$0xff] %v1295_v40  ;;  %v1367_v40 = vld [vmem:[#allocation3 + $0x60] sm:$0xff] (!%p1747_p4)  ;;  %v2272_v46 = vpop.eup (!%p1747_p4), %2271  ;;  %2281 = vrcp.f32 (!%p1747_p4), %v1368_v15 }
 0x341   : > { %1414 = vperm.xlu1 (!%p1747_p4), %2256, %v2266_v53   ;;  %2283 = vrcp.f32 (!%p1747_p4), %v1367_v40  ;;  %v1492_v40 = vld [vmem:[%s3184_s3 + $0x48] sm:$0xff] (!%p1747_p4) }
 0x342   : > { %1409 = vperm.xlu0 (!%p1747_p4), %2255, %v2268_v45   ;;  %2285 = vrcp.f32 (!%p1747_p4), %v1370_v21 }
 0x343   : > { %2287 = vrcp.f32 (!%p1747_p4), %v1369_v28 }
 0x344   : > { %v1947_v41 = vpop.f32.mrb[4].mxu1 }
 0x345   : > { %v1298_v10 = vadd.f32 %v1947_v41, %v1282_v23  ;;  %v1146_v49 = vpop.f32.mrb[5].mxu1  ;;  %1424 = vperm.xlu1 (!%p1747_p4), %2256, %v2270_v5   ;;  %v2274_v23 = vpop.eup (!%p1747_p4), %2273 }
 0x346   : > { %v1297_v26 = vadd.f32 %v1281_v14, %v1146_v49  ;;  %1419 = vperm.xlu0 (!%p1747_p4), %2255, %v2272_v46   ;;  %v2276_v14 = vpop.eup (!%p1747_p4), %2275  ;;  %v1348_v3 = vld [vmem:[#allocation4 + $0x48] sm:$0xff] (!%p1747_p4)  ;;  %v1491_v46 = vld [vmem:[%s3184_s3 + $0x40] sm:$0xff] (!%p1747_p4) }
 0x347   : > { %1314 = vst [vmem:[#allocation4 + $0x58] sm:$0xff] %v1298_v10  ;;  %v1935_v56 = vpop.f32.mrb[34].mxu0  ;;  %v2278_v41 = vpop.eup (!%p1747_p4), %2277  ;;  %v1347_v12 = vld [vmem:[#allocation4 + $0x40] sm:$0xff] (!%p1747_p4) }
 0x348   : > { %1313 = vst [vmem:[#allocation4 + $0x50] sm:$0xff] %v1297_v26  ;;  %v1290_v32 = vadd.f32 %v1935_v56, %v1274_v24  ;;  %v1106_v52 = vpop.f32.mrb[35].mxu0  ;;  %v1950_v48 = vpop.f32.mrb[6].mxu1  ;;  %v1515_v26 = vld [vmem:[%s3183_s2] sm:$0xff] (!%p1747_p4)  ;;  %v1517_v24 = vld [vmem:[%s3183_s2 + $0x10] sm:$0xff] (!%p1747_p4) }
 0x349   : > { %v1289_v54 = vadd.f32 %v1273_v30, %v1106_v52  ;;  %v1300_v13 = vadd.f32 %v1950_v48, %v1284_v35  ;;  %v1156_v55 = vpop.f32.mrb[7].mxu1  ;;  %1434 = vperm.xlu1 (!%p1747_p4), %2256, %v2274_v23   ;;  %v2280_v4 = vpop.eup (!%p1747_p4), %2279  ;;  %1986 = vmatprep.mubr.f32.mxu0 (!%p1747_p4), %v1515_v26  ;;  %v1339_v56 = vld [vmem:[#allocation4] sm:$0xff] (!%p1747_p4)  ;;  %v1340_v52 = vld [vmem:[#allocation4 + $0x8] sm:$0xff] (!%p1747_p4)  ;;  %v1493_v26 = vld [vmem:[%s3184_s3 + $0x50] sm:$0xff] (!%p1747_p4) }
 0x34a   : > { %1306 = vst [vmem:[#allocation4 + $0x18] sm:$0xff] %v1290_v32  ;;  %v1299_v33 = vadd.f32 %v1283_v44, %v1156_v55  ;;  %1429 = vperm.xlu0 (!%p1747_p4), %2255, %v2276_v14   ;;  %v2282_v29 = vpop.eup (!%p1747_p4), %2281  ;;  %1989 = vmatprep.mubr.f32.mxu1 (!%p1747_p4), %v1517_v24  ;;  %v1485_v32 = vld [vmem:[%s3184_s3 + $0x10] sm:$0xff] (!%p1747_p4)  ;;  %v1484_v55 = vld [vmem:[%s3184_s3 + $0x8] sm:$0xff] (!%p1747_p4) }
 0x34b   : > { %1305 = vst [vmem:[#allocation4 + $0x10] sm:$0xff] %v1289_v54  ;;  %1316 = vst [vmem:[#allocation4 + $0x68] sm:$0xff] %v1300_v13  ;;  %v2284_v10 = vpop.eup (!%p1747_p4), %2283  ;;  %v1483_v54 = vld [vmem:[%s3184_s3] sm:$0xff] (!%p1747_p4) }
 0x34c   : > { %1315 = vst [vmem:[#allocation4 + $0x60] sm:$0xff] %v1299_v33  ;;  %v1953_v20 = vpop.f32.mrb[8].mxu1  ;;  %v2286_v49 = vpop.eup (!%p1747_p4), %2285 }
 0x34d   : > { %v1302_v7 = vadd.f32 %v1953_v20, %v1286_v63  ;;  %v1166_v43 = vpop.f32.mrb[9].mxu1  ;;  %1338 = sbr.rel (%p1747_p4) target bundleno = 1242 (0x4da), region = 82  ;;  %1444 = vperm.xlu1 (!%p1747_p4), %2256, %v2278_v41   ;;  %v2288_v22 = vpop.eup (!%p1747_p4), %2287 }
 0x34e   : > { %v1301_v58 = vadd.f32 %v1285_v62, %v1166_v43  ;;  %1439 = vperm.xlu0 (!%p1747_p4), %2255, %v2280_v4   ;;  %v1350_v14 = vld [vmem:[#allocation4 + $0x58] sm:$0xff] (!%p1747_p4) }
 0x34f   : > { %v1938_v36 = vpop.f32.mrb[36].mxu0  ;;  %1318 = vst [vmem:[#allocation4 + $0x78] sm:$0xff] %v1302_v7  ;;  %v1349_v4 = vld [vmem:[#allocation4 + $0x50] sm:$0xff] (!%p1747_p4) }
 0x350   : > { %v1292_v25 = vadd.f32 %v1938_v36, %v1276_v27  ;;  %v1116_v11 = vpop.f32.mrb[37].mxu0  ;;  %1317 = vst [vmem:[#allocation4 + $0x70] sm:$0xff] %v1301_v58 }
 0x351   : > { %v1291_v9 = vadd.f32 %v1275_v6, %v1116_v11  ;;  %1454 = vperm.xlu1 (!%p1747_p4), %2256, %v2282_v29   ;;  %v1342_v60 = vld [vmem:[#allocation4 + $0x18] sm:$0xff] (!%p1747_p4) }
 0x352   : > { %1308 = vst [vmem:[#allocation4 + $0x28] sm:$0xff] %v1292_v25  ;;  %1449 = vperm.xlu0 (!%p1747_p4), %2255, %v2284_v10   ;;  %v1341_v30 = vld [vmem:[#allocation4 + $0x10] sm:$0xff] (!%p1747_p4) }
 0x353   : > { %1307 = vst [vmem:[#allocation4 + $0x20] sm:$0xff] %v1291_v9  ;;  %v1488_v9 = vld [vmem:[%s3184_s3 + $0x28] sm:$0xff] (!%p1747_p4) }
 0x355   : > { %1464 = vperm.xlu1 %2256, %v2286_v49  }
 0x356   : > { %1459 = vperm.xlu0 %2255, %v2288_v22   ;;  %v1494_v22 = vld [vmem:[%s3184_s3 + $0x58] sm:$0xff] }
 0x359   : > { %v1344_v7 = vld [vmem:[#allocation4 + $0x28] sm:$0xff] }
 0x35a   : > { %v1343_v6 = vld [vmem:[#allocation4 + $0x20] sm:$0xff] }
 0x3b8   : > { %v1400_v35 = vpop.permute.xlu1 %1399 }
 0x3b9   : > { %v1390_v37 = vpop.permute.xlu0 %1389  ;;  %v1469_v44 = vmul.f32 %v1400_v35, %v1341_v30 }
 0x3ba   : > { %v1467_v48 = vmul.f32 %v1390_v37, %v1339_v56  ;;  %v1352_v37 = vld [vmem:[#allocation4 + $0x68] sm:$0xff] }
 0x3bb   : > { %v1501_v33 = vmul.f32 %v1485_v32, %v1469_v44  ;;  %v1351_v44 = vld [vmem:[#allocation4 + $0x60] sm:$0xff] }
 0x3bc   : > { %v1405_v34 = vpop.permute.xlu1 %1404  ;;  %v1499_v62 = vmul.f32 %v1483_v54, %v1467_v48  ;;  %v1496_v48 = vld [vmem:[%s3184_s3 + $0x68] sm:$0xff] }
 0x3bd   : > { %v1470_v13 = vmul.f32 %v1405_v34, %v1342_v60  ;;  %v1395_v1 = vpop.permute.xlu0 %1394 }
 0x3be   : > { %v1468_v51 = vmul.f32 %v1395_v1, %v1340_v52 }
 0x3bf   : > { %v1502_v63 = vmul.f32 %v1486_v2, %v1470_v13  ;;  %v1495_v2 = vld [vmem:[%s3184_s3 + $0x60] sm:$0xff] }
 0x3c0   : > { %v1500_v20 = vmul.f32 %v1484_v55, %v1468_v51  ;;  %v1415_v27 = vpop.permute.xlu1 %1414  ;;  %v1354_v55 = vld [vmem:[#allocation4 + $0x78] sm:$0xff] }
 0x3c1   : > { %v1410_v43 = vpop.permute.xlu0 %1409  ;;  %v2036_v58 = vpack.c.bf16 %v1502_v63, %v1501_v33  ;;  %v1472_v25 = vmul.f32 %v1415_v27, %v1344_v7  ;;  %v1353_v33 = vld [vmem:[#allocation4 + $0x70] sm:$0xff] }
 0x3c2   : > { %v2032_v36 = vpack.c.bf16 %v1500_v20, %v1499_v62  ;;  %v1471_v11 = vmul.f32 %v1410_v43, %v1343_v6  ;;  %v1498_v20 = vld [vmem:[%s3184_s3 + $0x78] sm:$0xff]  ;;  %v1497_v27 = vld [vmem:[%s3184_s3 + $0x70] sm:$0xff] }
 0x3c3   : > { %v1504_v16 = vmul.f32 %v1488_v9, %v1472_v25 }
 0x3c4   : > { %2033 = vmatprep.subr.bf16.mxu0 %v2032_v36  ;;  %2080 = vmatprep.subr.bf16.mxu1 %v2032_v36  ;;  %v1503_v17 = vmul.f32 %v1487_v59, %v1471_v11  ;;  %v1425_v47 = vpop.permute.xlu1 %1424 }
 0x3c5   : > { %2035 = vmatpush3.bf16.xpose.msra.mxu0 %v2032_v36  ;;  %2088 = vmatpush3.bf16.xpose.msra.mxu1 %v2032_v36  ;;  %v1420_v61 = vpop.permute.xlu0 %1419  ;;  %v1474_v0 = vmul.f32 %v1425_v47, %v1346_v39  ;;  %v1518_v36 = vld [vmem:[%s3183_s2 + $0x18] sm:$0xff] }
 0x3c6   : > { %2037 = vmatprep.subr.bf16.mxu0 %v2036_v58  ;;  %2081 = vmatprep.subr.bf16.mxu1 %v2036_v58  ;;  %v2040_v18 = vpack.c.bf16 %v1504_v16, %v1503_v17  ;;  %v1473_v57 = vmul.f32 %v1420_v61, %v1345_v8 }
 0x3c7   : > { %v1506_v38 = vmul.f32 %v1490_v42, %v1474_v0 }
 0x3c8   : > { %v1505_v50 = vmul.f32 %v1489_v19, %v1473_v57  ;;  %v1435_v31 = vpop.permute.xlu1 %1434 }
 0x3c9   : > { %v1430_v53 = vpop.permute.xlu0 %1429  ;;  %v1476_v15 = vmul.f32 %v1435_v31, %v1348_v3 }
 0x3ca   : > { %v2044_v45 = vpack.c.bf16 %v1506_v38, %v1505_v50  ;;  %v1475_v5 = vmul.f32 %v1430_v53, %v1347_v12 }
 0x3cb   : > { %v1508_v21 = vmul.f32 %v1492_v40, %v1476_v15 }
 0x3cc   : > { %v1507_v23 = vmul.f32 %v1491_v46, %v1475_v5  ;;  %v1445_v28 = vpop.permute.xlu1 %1444 }
 0x3cd   : > { %2039 = vmatpush3.bf16.xpose.msra.mxu0 %v2036_v58  ;;  %2089 = vmatpush3.bf16.xpose.msra.mxu1 %v2036_v58  ;;  %v1440_v41 = vpop.permute.xlu0 %1439  ;;  %v1478_v10 = vmul.f32 %v1445_v28, %v1350_v14  ;;  %v1516_v58 = vld [vmem:[%s3183_s2 + $0x8] sm:$0xff] }
 0x3ce   : > { %2041 = vmatprep.subr.bf16.mxu0 %v2040_v18  ;;  %2082 = vmatprep.subr.bf16.mxu1 %v2040_v18  ;;  %v2048_v29 = vpack.c.bf16 %v1508_v21, %v1507_v23  ;;  %v1477_v49 = vmul.f32 %v1440_v41, %v1349_v4 }
 0x3cf   : > { %v1510_v24 = vmul.f32 %v1494_v22, %v1478_v10 }
 0x3d0   : > { %v1509_v30 = vmul.f32 %v1493_v26, %v1477_v49  ;;  %v1455_v35 = vpop.permute.xlu1 %1454 }
 0x3d1   : > { %v1450_v56 = vpop.permute.xlu0 %1449  ;;  %v1480_v32 = vmul.f32 %v1455_v35, %v1352_v37 }
 0x3d2   : > { %v2052_v60 = vpack.c.bf16 %v1510_v24, %v1509_v30  ;;  %v1479_v52 = vmul.f32 %v1450_v56, %v1351_v44 }
 0x3d3   : > { %v1512_v34 = vmul.f32 %v1496_v48, %v1480_v32 }
 0x3d4   : > { %v1511_v54 = vmul.f32 %v1495_v2, %v1479_v52  ;;  %v1465_v13 = vpop.permute.xlu1 %1464 }
 0x3d5   : > { %2043 = vmatpush3.bf16.xpose.msra.mxu0 %v2040_v18  ;;  %2090 = vmatpush3.bf16.xpose.msra.mxu1 %v2040_v18  ;;  %v1460_v1 = vpop.permute.xlu0 %1459  ;;  %v1482_v63 = vmul.f32 %v1465_v13, %v1354_v55 }
 0x3d6   : > { %2045 = vmatprep.subr.bf16.mxu0 %v2044_v45  ;;  %2083 = vmatprep.subr.bf16.mxu1 %v2044_v45  ;;  %v2056_v51 = vpack.c.bf16 %v1512_v34, %v1511_v54  ;;  %v1481_v62 = vmul.f32 %v1460_v1, %v1353_v33 }
 0x3d7   : > { %v1514_v7 = vmul.f32 %v1498_v20, %v1482_v63 }
 0x3d8   : > { %v1513_v43 = vmul.f32 %v1497_v27, %v1481_v62 }
 0x3da   : > { %v2060_v6 = vpack.c.bf16 %v1514_v7, %v1513_v43 }
 0x3dd   : > { %2047 = vmatpush3.bf16.xpose.msra.mxu0 %v2044_v45  ;;  %2091 = vmatpush3.bf16.xpose.msra.mxu1 %v2044_v45 }
 0x3de   : > { %2049 = vmatprep.subr.bf16.mxu0 %v2048_v29  ;;  %2084 = vmatprep.subr.bf16.mxu1 %v2048_v29 }
 0x3e5   : > { %2051 = vmatpush3.bf16.xpose.msra.mxu0 %v2048_v29  ;;  %2092 = vmatpush3.bf16.xpose.msra.mxu1 %v2048_v29 }
 0x3e6   : > { %2053 = vmatprep.subr.bf16.mxu0 %v2052_v60  ;;  %2085 = vmatprep.subr.bf16.mxu1 %v2052_v60 }
 0x3ed   : > { %2055 = vmatpush3.bf16.xpose.msra.mxu0 %v2052_v60  ;;  %2093 = vmatpush3.bf16.xpose.msra.mxu1 %v2052_v60 }
 0x3ee   : > { %2057 = vmatprep.subr.bf16.mxu0 %v2056_v51  ;;  %2086 = vmatprep.subr.bf16.mxu1 %v2056_v51 }
 0x3f5   : > { %2059 = vmatpush3.bf16.xpose.msra.mxu0 %v2056_v51  ;;  %2094 = vmatpush3.bf16.xpose.msra.mxu1 %v2056_v51 }
 0x3f6   : > { %2061 = vmatprep.subr.bf16.mxu0 %v2060_v6  ;;  %2087 = vmatprep.subr.bf16.mxu1 %v2060_v6 }
 0x3fd   : > { %2063 = vmatpush3.bf16.xpose.msra.mxu0 %v2060_v6  ;;  %2095 = vmatpush3.bf16.xpose.msra.mxu1 %v2060_v6 }
 0x404   : > { %1987 = vmatmul.mubr.f32.vlgmr.msra.gmra.mrb[0].mxu0 %v1516_v58  ;;  %1990 = vmatmul.mubr.f32.vlgmr.msra.gmra.mrb[0].mxu1 %v1518_v36 }
 0x4d7   : > { %v1988_v25 = vpop.f32.mrb[0].mxu0  ;;  %v1991_v11 = vpop.f32.mrb[0].mxu1 }
 0x4d8   : > { %1605 = vst [vmem:[%s2540_s30 + $0x8] sm:$0xff] %v1988_v25  ;;  %1607 = vst [vmem:[%s2540_s30 + $0x18] sm:$0xff] %v1991_v11  ;;  %v1585_v9 = vpop.f32.mrb[1].mxu0  ;;  %v1595_v59 = vpop.f32.mrb[1].mxu1 }
 0x4d9   : > { %1604 = vst [vmem:[%s2540_s30] sm:$0xff] %v1585_v9  ;;  %1606 = vst [vmem:[%s2540_s30 + $0x10] sm:$0xff] %v1595_v59 }
 0x4da PF: > { %s1753_s5 = sshll.u32 %s2387_s21, 9  ;;  %s1622_s20 = sshll.u32 %s2540_s30, 4  ;;  %s3119_s20 = int_to_ptr.vmem [resolvable:$true] %s1622_s20 }
 0x4db   : > { %s3116_s13 = scalar_lea.hbm %s3185_s4, %s1753_s5  ;;  %s3190_s26 = sand.u32 1, %s2367_s16  }
 0x4dc   : > { %s3123_s18 = scalar_lea.sflag [#allocation7], %s3190_s26  ;;  %s2289_s8 = scalar_lea.vmem %s3119_s20, 512 }
 0x4dd   : > { %p2290_p5 = scmp.ne.s32.totalorder %s3119_s20, %s2289_s8  ;;  %s2405_s21 = smov [#allocation6]  }
 0x4de   : > { %s2293_s9 = sshll.u32 %s2405_s21, 4  ;;  %s2294_s9 = int_to_ptr.vmem [resolvable:$false] %s2293_s9 }
 0x4df   : > { %p2291_p6 = pnand %p2290_p5, %p2505_p7  ;;  %s2295_s6 = scalar_lea.vmem %s2294_s9, 1024 }
 0x4e0   : > { %p2296_p9 = scmp.lt.s32.totalorder %s3119_s20, %s2294_s9  ;;  %p2297_p10 = scmp.lt.s32.totalorder %s2295_s6, %s2289_s8 }
 0x4e1   : > { %p2292_p8 = pneg %p2291_p6 }
 0x4e2   : > { %p2298_p11 = por %p2297_p10, %p2296_p9 }
 0x4e4   : > { %p2299_p13 = pnand %p2298_p11, %p2292_p8 }
 0x4e6   : > { %2302 = shalt.err (!%p2299_p13)
}
 0x4e7   : > { %s2303_s30 = scalar_lea.hbm %s3116_s13, 512  ;;  %s2307_s14 = scalar_lea.hbm %s3185_s4, 1024 }
 0x4e8   : > { %p2304_p0 = scmp.ne.s32.totalorder %s3116_s13, %s2303_s30  ;;  %p2308_p3 = scmp.lt.u32.totalorder %s3116_s13, %s3185_s4 }
 0x4e9   : > { %p2309_p4 = scmp.lt.u32.totalorder %s2307_s14, %s2303_s30  ;;  %p2311_p6 = scmp.lt.u32.totalorder %s2303_s30, %s3116_s13 }
 0x4ea   : > { %p2305_p1 = pnand %p2304_p0, %p2505_p7 }
 0x4eb   : > { %p2310_p5 = por %p2309_p4, %p2308_p3 }
 0x4ec   : > { %p2306_p2 = pneg %p2305_p1 }
 0x4ed   : > { %p2312_p8 = por %p2311_p6, %p2310_p5 }
 0x4ef   : > { %p2313_p9 = pnand %p2312_p8, %p2306_p2 }
 0x4f1   : > { %2316 = shalt.err (!%p2313_p9)
}
 0x4f2   : > { %s2406_s8 = smov 128   ;;  %s2407_s21 = smov 8  }
 0x4f3   : > { %2096 = dma.vmem_to_hbm [thread:$0]  (%p2505_p7), %s3119_s20, 512, %s3116_s13, %s3123_s18, %s2406_s8, %s2406_s8, %s2407_s21  }
 0x4f4 PF: > { %p2102_p10 = scmp.ge.s32.totalorder %s2399_s24, 2  ;;  %s1637_s9 = sand.u32 1, %s2363_s15  }
 0x4f5   : > { %s1638_s6 = scalar_lea.sflag [#allocation7], %s1637_s9 }
 0x4f6   : > { %p2099_p11 = pnand %p2102_p10, %p2513_p12 }
 0x4f8   : > { %2358 = dma.done.wait (!%p2099_p11), %s1638_s6, 512  }
 0x4f9   : > { %2360 = vsyncadd (!%p2099_p11), %s1638_s6, 4294966784  ;;  %s17_s24 = sadd.s32 1, %s2399_s24   ;;  %s3191_s15 = smov %s2367_s16 }
 0x4fa   : > { %p14_p13 = scmp.ge.s32.totalorder %s17_s24, 6   ;;  %s3192_s16 = smov %s2371_s17 }
 0x4fb   : > { %s3193_s17 = smov %s2518_s11  ;;  %s3194_s18 = smov %s2379_s19 }
 0x4fc   : > { %s3195_s19 = smov %s2521_s12  ;;  %s3196_s20 = smov %s2391_s22 }
 0x4fd   : > { %s3197_s21 = smov %s2395_s23  ;;  %s3198_s22 = smov %s3201_s27 }
 0x4fe   : > { %s3199_s23 = smov %s3205_s28  ;;  %16 = sbr.rel (!%p14_p13) target bundleno = 6 (0x6), region = 122 }
 0x505   :  { %1643 = vsyncpa [#allocation7], 1 }
 0x506   :  { %1645 = vsyncpa [#allocation7 + $0x1], 1 }

</bundles_post_ra>
